<compile_context>
chip_gen: v5e
topology: v5e:2x2
jax: 0.10.0
libtpu: 0.0.40
codegen_flags: <defaults>
</compile_context>

<pallas_src>
import math

import jax
import jax.numpy as jnp
from jax.experimental import pallas as pl
from jax.experimental.pallas import tpu as pltpu


# ----------------------------------------------------------------------------
# small helpers
# ----------------------------------------------------------------------------
def _same_pad(size, k, s):
    out = -(-size // s)                      # ceil(size / s)
    pad = max((out - 1) * s + k - size, 0)
    return pad // 2, pad - pad // 2, out


def _row_tile(m, target=512):
    """Largest tile <= target that divides m (all our M's are multiples of 8)."""
    if m <= target:
        return m
    t = target
    while m % t:
        t //= 2
    return max(t, 8)


_PARALLEL_1D = pltpu.CompilerParams(dimension_semantics=("parallel",))


# ----------------------------------------------------------------------------
# Fused pointwise conv: (M, K) @ (K, N) + bias (+ SiLU), BN pre-folded into w.
# Grid over rows (M), full K/N per block (channels are small), bf16 MXU inputs,
# fp32 accumulation, bf16 output.
# ----------------------------------------------------------------------------
def matmul_bn_act(x, w, b, *, act, out_dtype=jnp.bfloat16):
    x = x.astype(jnp.bfloat16)
    M, K = x.shape
    Nc = w.shape[1]
    tm = _row_tile(M)

    def kernel(x_ref, w_ref, b_ref, o_ref):
        y = jnp.dot(x_ref[...], w_ref[...],
                    preferred_element_type=jnp.float32) + b_ref[...]
        if act:
            y = y * jax.nn.sigmoid(y)          # SiLU
        o_ref[...] = y.astype(o_ref.dtype)

    return pl.pallas_call(
        kernel,
        out_shape=jax.ShapeDtypeStruct((M, Nc), out_dtype),
        grid=(M // tm,),
        in_specs=[
            pl.BlockSpec((tm, K), lambda i: (i, 0)),
            pl.BlockSpec((K, Nc), lambda i: (0, 0)),
            pl.BlockSpec((1, Nc), lambda i: (0, 0)),
        ],
        out_specs=pl.BlockSpec((tm, Nc), lambda i: (i, 0)),
        compiler_params=_PARALLEL_1D,
    )(x, w, b)


# ----------------------------------------------------------------------------
# Depthwise conv (+folded BN + SiLU) with fused SE average-pool.
# Input is pre-phase-split: phases (N, s*s, Hs, Ws, C); taps are shifted static
# slices generated inside the kernel (no k^2 im2col tensor in HBM).
# ----------------------------------------------------------------------------
def make_phases(x, k, s):
    """x:(N,H,W,C) -> phases (N, s*s, Hs, Ws, C), Ho, Wo  (TF-SAME padding)."""
    N, H, W, C = x.shape
    pt, pb, Ho = _same_pad(H, k, s)
    pL, pR, Wo = _same_pad(W, k, s)
    Hp, Wp = H + pt + pb, W + pL + pR
    Hs, Ws = -(-Hp // s), -(-Wp // s)
    xp = jnp.pad(x, ((0, 0), (pt, pb + Hs * s - Hp),
                     (pL, pR + Ws * s - Wp), (0, 0)))
    if s == 1:
        phases = xp[:, None]
    else:
        phases = xp.reshape(N, Hs, s, Ws, s, C)
        phases = jnp.transpose(phases, (0, 2, 4, 1, 3, 5))
        phases = phases.reshape(N, s * s, Hs, Ws, C)
    return phases, Ho, Wo


def depthwise_bn_silu_pool(phases, w, b, *, k, s, Ho, Wo):
    N, ss, Hs, Ws, C = phases.shape

    def kernel(ph_ref, w_ref, b_ref, o_ref, pool_ref):
        acc = jnp.zeros((Ho, Wo, C), jnp.float32)
        for kh in range(k):
            for kw in range(k):
                p = (kh % s) * s + (kw % s)
                ah, aw = kh // s, kw // s
                tap = ph_ref[0, p, ah:ah + Ho, aw:aw + Wo, :]
                acc = acc + tap.astype(jnp.float32) * w_ref[kh * k + kw]
        y = acc + b_ref[...]
        y = y * jax.nn.sigmoid(y)              # SiLU
        o_ref[0] = y.astype(o_ref.dtype)
        pool_ref[0] = jnp.mean(y.reshape(Ho * Wo, C), axis=0, keepdims=True)

    return pl.pallas_call(
        kernel,
        out_shape=(jax.ShapeDtypeStruct((N, Ho, Wo, C), jnp.bfloat16),
                   jax.ShapeDtypeStruct((N, 1, C), jnp.float32)),
        grid=(N,),
        in_specs=[
            pl.BlockSpec((1, ss, Hs, Ws, C), lambda n: (n, 0, 0, 0, 0)),
            pl.BlockSpec((k * k, 1, C), lambda n: (0, 0, 0)),
            pl.BlockSpec((1, C), lambda n: (0, 0)),
        ],
        out_specs=(pl.BlockSpec((1, Ho, Wo, C), lambda n: (n, 0, 0, 0)),
                   pl.BlockSpec((1, 1, C), lambda n: (n, 0, 0))),
        compiler_params=_PARALLEL_1D,
    )(phases, w, b)


# ----------------------------------------------------------------------------
# Squeeze-and-excitation: both FC layers fused in one tiny kernel.
# ----------------------------------------------------------------------------
def se_gate(pooled, w1, b1, w2, b2):
    N, mid = pooled.shape

    def kernel(p_ref, w1_ref, b1_ref, w2_ref, b2_ref, g_ref):
        h = jnp.dot(p_ref[...].astype(jnp.bfloat16), w1_ref[...],
                    preferred_element_type=jnp.float32) + b1_ref[...]
        h = h * jax.nn.sigmoid(h)              # SiLU
        g = jnp.dot(h.astype(jnp.bfloat16), w2_ref[...],
                    preferred_element_type=jnp.float32) + b2_ref[...]
        g_ref[...] = jax.nn.sigmoid(g)

    vm = pl.BlockSpec(memory_space=pltpu.MemorySpace.VMEM)
    return pl.pallas_call(
        kernel,
        out_shape=jax.ShapeDtypeStruct((N, mid), jnp.float32),
        in_specs=[vm, vm, vm, vm, vm],
        out_specs=vm,
    )(pooled, w1, b1, w2, b2)


# ----------------------------------------------------------------------------
# MBConv tail: SE-gate multiply + 1x1 projection (BN folded) + residual add.
# ----------------------------------------------------------------------------
def mbconv_tail(x, gate, w, b, shortcut=None):
    N, HW, mid = x.shape
    out_ch = w.shape[1]

    def compute(x_ref, g_ref, w_ref, b_ref, s_ref, o_ref):
        xs = (x_ref[0].astype(jnp.float32) * g_ref[0]).astype(jnp.bfloat16)
        y = jnp.dot(xs, w_ref[...], preferred_element_type=jnp.float32) + b_ref[...]
        if s_ref is not None:
            y = y + s_ref[0].astype(jnp.float32)
        o_ref[0] = y.astype(o_ref.dtype)

    in_specs = [
        pl.BlockSpec((1, HW, mid), lambda n: (n, 0, 0)),
        pl.BlockSpec((1, 1, mid), lambda n: (n, 0, 0)),
        pl.BlockSpec((mid, out_ch), lambda n: (0, 0)),
        pl.BlockSpec((1, out_ch), lambda n: (0, 0)),
    ]
    out_spec = pl.BlockSpec((1, HW, out_ch), lambda n: (n, 0, 0))
    out_shape = jax.ShapeDtypeStruct((N, HW, out_ch), jnp.bfloat16)

    if shortcut is None:
        def kernel(x_ref, g_ref, w_ref, b_ref, o_ref):
            compute(x_ref, g_ref, w_ref, b_ref, None, o_ref)
        args = (x, gate, w, b)
    else:
        def kernel(x_ref, g_ref, w_ref, b_ref, s_ref, o_ref):
            compute(x_ref, g_ref, w_ref, b_ref, s_ref, o_ref)
        in_specs = in_specs + [pl.BlockSpec((1, HW, out_ch), lambda n: (n, 0, 0))]
        args = (x, gate, w, b, shortcut)

    return pl.pallas_call(
        kernel, out_shape=out_shape, grid=(N,),
        in_specs=in_specs, out_specs=out_spec,
        compiler_params=_PARALLEL_1D,
    )(*args)


# ----------------------------------------------------------------------------
# Head 1x1 conv (+folded BN + SiLU) + global average pool + classifier, fused.
# ----------------------------------------------------------------------------
def head_pool_classify(x, head_w, head_b, cls_w, cls_b):
    N, HW, C = x.shape
    HC = head_w.shape[1]
    NC = cls_w.shape[1]

    def kernel(x_ref, hw_ref, hb_ref, cw_ref, cb_ref, o_ref):
        y = jnp.dot(x_ref[0], hw_ref[...],
                    preferred_element_type=jnp.float32) + hb_ref[...]
        y = y * jax.nn.sigmoid(y)              # SiLU
        pooled = jnp.mean(y, axis=0, keepdims=True)           # (1, HC)
        logits = jnp.dot(pooled.astype(jnp.bfloat16), cw_ref[...],
                         preferred_element_type=jnp.float32) + cb_ref[...]
        o_ref[0] = logits

    out = pl.pallas_call(
        kernel,
        out_shape=jax.ShapeDtypeStruct((N, 1, NC), jnp.float32),
        grid=(N,),
        in_specs=[
            pl.BlockSpec((1, HW, C), lambda n: (n, 0, 0)),
            pl.BlockSpec((C, HC), lambda n: (0, 0)),
            pl.BlockSpec((1, HC), lambda n: (0, 0)),
            pl.BlockSpec((HC, NC), lambda n: (0, 0)),
            pl.BlockSpec((1, NC), lambda n: (0, 0)),
        ],
        out_specs=pl.BlockSpec((1, 1, NC), lambda n: (n, 0, 0)),
        compiler_params=_PARALLEL_1D,
    )(x, head_w, head_b, cls_w, cls_b)
    return out.reshape(N, NC)


# ----------------------------------------------------------------------------
# Model definition (B4-inspired stages): (in_ch, out_ch, kernel, stride, expand)
# ----------------------------------------------------------------------------
STEM_CH = 48
HEAD_CH = 1792      # self.conv.num_features for tf_efficientnet_b4_ns
BLOCK_CFGS = [
    (48, 24, 3, 1, 1),
    (24, 32, 3, 2, 6),
    (32, 32, 3, 1, 6),     # residual block
    (32, 56, 5, 2, 6),
    (56, 112, 3, 2, 6),
    (112, 160, 5, 1, 6),
    (160, 272, 5, 2, 6),
    (272, 448, 3, 1, 6),
]
SE_RATIO = 0.25


class ParamGen:
    def __init__(self, seed):
        self.key = jax.random.PRNGKey(seed)
        self.i = 0

    def normal(self, shape, std):
        self.i += 1
        k = jax.random.fold_in(self.key, self.i)
        return (std * jax.random.normal(k, shape)).astype(jnp.float32)

    def bn(self, c):
        # Folded inference BN: y = x * scale + bias (scale ~ 1, bias ~ 0).
        return 1.0 + self.normal((1, c), 0.05), self.normal((1, c), 0.05)


def make_block_params(pg, in_ch, out_ch, k, expand):
    mid = in_ch * expand
    se_dim = max(1, int(in_ch * SE_RATIO))
    p = {}
    if expand != 1:
        w = pg.normal((in_ch, mid), 1.0 / math.sqrt(in_ch))
        scale, bias = pg.bn(mid)
        p["exp_w"] = (w * scale).astype(jnp.bfloat16)     # BN folded
        p["exp_b"] = bias
    dw = pg.normal((k * k, 1, mid), 1.0 / k)
    scale, bias = pg.bn(mid)
    p["dw_w"] = (dw * scale).astype(jnp.float32)          # BN folded (VPU path)
    p["dw_b"] = bias
    p["se_w1"] = pg.normal((mid, se_dim), 1.0 / math.sqrt(mid)).astype(jnp.bfloat16)
    p["se_b1"] = jnp.zeros((1, se_dim), jnp.float32)
    p["se_w2"] = pg.normal((se_dim, mid), 1.0 / math.sqrt(se_dim)).astype(jnp.bfloat16)
    p["se_b2"] = jnp.zeros((1, mid), jnp.float32)
    w = pg.normal((mid, out_ch), 1.0 / math.sqrt(mid))
    scale, bias = pg.bn(out_ch)
    p["proj_w"] = (w * scale).astype(jnp.bfloat16)        # BN folded
    p["proj_b"] = bias
    return p


def make_params(output_classes, seed=42):
    pg = ParamGen(seed)
    w = pg.normal((3 * 3 * 3, STEM_CH), 1.0 / math.sqrt(27))
    scale, bias = pg.bn(STEM_CH)
    params = {"stem_w": (w * scale).astype(jnp.bfloat16), "stem_b": bias}
    params["blocks"] = [
        make_block_params(pg, i, o, k, e) for (i, o, k, s, e) in BLOCK_CFGS
    ]
    w = pg.normal((BLOCK_CFGS[-1][1], HEAD_CH),
                  1.0 / math.sqrt(BLOCK_CFGS[-1][1]))
    scale, bias = pg.bn(HEAD_CH)
    params["head_w"] = (w * scale).astype(jnp.bfloat16)
    params["head_b"] = bias
    params["cls_w"] = pg.normal((HEAD_CH, output_classes),
                                1.0 / math.sqrt(HEAD_CH)).astype(jnp.bfloat16)
    params["cls_b"] = jnp.zeros((1, output_classes), jnp.float32)
    return params


# ----------------------------------------------------------------------------
# forward
# ----------------------------------------------------------------------------
def stem_im2col(x, k=3, s=2):
    """Lane-major im2col (channel concat — no 5-D transpose), TF-SAME, stride 2."""
    N, H, W, C = x.shape
    pt, pb, Ho = _same_pad(H, k, s)
    pL, pR, Wo = _same_pad(W, k, s)
    xp = jnp.pad(x, ((0, 0), (pt, pb), (pL, pR), (0, 0)))
    taps = [xp[:, kh:kh + s * Ho:s, kw:kw + s * Wo:s, :]
            for kh in range(k) for kw in range(k)]
    patches = jnp.concatenate(taps, axis=-1)               # (N, Ho, Wo, k*k*C)
    return patches.reshape(N * Ho * Wo, k * k * C), Ho, Wo


def mbconv(h, N, H, W, p, in_ch, out_ch, k, s, expand):
    """h: (N*H*W, in_ch) flattened NHWC activations (bf16)."""
    mid = in_ch * expand
    shortcut = h

    # 1x1 expansion (matmul + folded BN + SiLU), skipped when expand == 1
    if expand != 1:
        h = matmul_bn_act(h, p["exp_w"], p["exp_b"], act=True)

    # depthwise k x k stride s (+BN+SiLU) with fused SE average-pool
    phases, Ho, Wo = make_phases(h.reshape(N, H, W, mid), k, s)
    act, pooled = depthwise_bn_silu_pool(phases, p["dw_w"], p["dw_b"],
                                         k=k, s=s, Ho=Ho, Wo=Wo)

    # squeeze-and-excitation (both FC layers in one kernel)
    gate = se_gate(pooled.reshape(N, mid),
                   p["se_w1"], p["se_b1"], p["se_w2"], p["se_b2"])

    # SE-scale + 1x1 projection (folded BN) + residual, fused
    use_res = (s == 1 and in_ch == out_ch)   # drop_path is identity at inference
    sc = shortcut.reshape(N, Ho * Wo, out_ch) if use_res else None
    out = mbconv_tail(act.reshape(N, Ho * Wo, mid), gate.reshape(N, 1, mid),
                      p["proj_w"], p["proj_b"], sc)
    return out.reshape(N * Ho * Wo, out_ch), Ho, Wo


def efficientnet_b4_forward(x_nchw, params):
    """x_nchw: (N, 3, H, W) float32 -> logits (N, output_classes) float32."""
    N = x_nchw.shape[0]
    x = jnp.transpose(x_nchw, (0, 2, 3, 1)).astype(jnp.float32)   # NCHW -> NHWC

    # stem: 3x3 stride-2 conv (lane-major im2col + fused matmul/BN/SiLU)
    patches, H, W = stem_im2col(x, 3, 2)
    h = matmul_bn_act(patches, params["stem_w"], params["stem_b"], act=True)

    # MBConv stages
    for cfg, p in zip(BLOCK_CFGS, params["blocks"]):
        in_ch, out_ch, k, s, expand = cfg
        h, H, W = mbconv(h, N, H, W, p, in_ch, out_ch, k, s, expand)

    # head 1x1 conv + BN + SiLU + global pool + classifier (one fused kernel)
    logits = head_pool_classify(h.reshape(N, H * W, BLOCK_CFGS[-1][1]),
                                params["head_w"], params["head_b"],
                                params["cls_w"], params["cls_b"])
    return logits


if __name__ == "__main__":
    output_classes = 10
    key = jax.random.PRNGKey(0)
    x = jax.random.normal(key, (2, 3, 64, 64), dtype=jnp.float32)  # small NCHW image

    params = make_params(output_classes, seed=42)
    out = efficientnet_b4_forward(x, params)
    out = jax.block_until_ready(out)

    assert out.shape == (2, output_classes), out.shape
    assert out.dtype == jnp.float32
    assert bool(jnp.all(jnp.isfinite(out)))
    print("KERNEL_OK")
</pallas_src>

<mosaic_0001>
module attributes {stable_mosaic.version = 11 : i64} {
  func.func @kernel(%arg0: i32, %arg1: memref<512x27xbf16, #tpu.memory_space<vmem>>, %arg2: memref<27x48xbf16, #tpu.memory_space<vmem>>, %arg3: memref<1x48xf32, #tpu.memory_space<vmem>>, %arg4: memref<512x48xbf16, #tpu.memory_space<vmem>>) attributes {dimension_semantics = [#tpu.dimension_semantics<parallel>], iteration_bounds = array<i64: 4>, scalar_prefetch = 0 : i64, scratch_operands = 0 : i64, tpu.core_type = #tpu.core_type<tc>, window_params = [{transform_indices = @transform_0, window_bounds = array<i64: 512, 27>}, {pipeline_mode = #tpu.pipeline_mode<synchronous>, transform_indices = @transform_1, window_bounds = array<i64: 27, 48>}, {pipeline_mode = #tpu.pipeline_mode<synchronous>, transform_indices = @transform_2, window_bounds = array<i64: 1, 48>}, {transform_indices = @transform_3, window_bounds = array<i64: 512, 48>}]} {
    %c0 = arith.constant 0 : index
    %c0_0 = arith.constant 0 : index
    %0 = vector.load %arg1[%c0, %c0_0] : memref<512x27xbf16, #tpu.memory_space<vmem>>, vector<512x27xbf16>
    %c0_1 = arith.constant 0 : index
    %c0_2 = arith.constant 0 : index
    %1 = vector.load %arg2[%c0_1, %c0_2] : memref<27x48xbf16, #tpu.memory_space<vmem>>, vector<27x48xbf16>
    %cst = arith.constant dense<0.000000e+00> : vector<512x48xf32>
    %2 = tpu.matmul %0, %1, %cst {dimension_numbers = #tpu.dot_dimension_numbers<[1], [0], [0], [1], [0, 0, 1, 1], [], []>} : vector<512x27xbf16>, vector<27x48xbf16>, vector<512x48xf32> -> vector<512x48xf32>
    %c0_3 = arith.constant 0 : index
    %c0_4 = arith.constant 0 : index
    %3 = vector.load %arg3[%c0_3, %c0_4] : memref<1x48xf32, #tpu.memory_space<vmem>>, vector<1x48xf32>
    %4 = vector.broadcast %3 : vector<1x48xf32> to vector<512x48xf32>
    %5 = arith.addf %2, %4 : vector<512x48xf32>
    %6 = arith.negf %5 : vector<512x48xf32>
    %7 = math.exp %6 : vector<512x48xf32>
    %cst_5 = arith.constant 1.000000e+00 : f32
    %8 = vector.broadcast %cst_5 : f32 to vector<512x48xf32>
    %9 = arith.addf %8, %7 : vector<512x48xf32>
    %10 = arith.divf %8, %9 : vector<512x48xf32>
    %11 = arith.mulf %5, %10 : vector<512x48xf32>
    %12 = arith.truncf %11 : vector<512x48xf32> to vector<512x48xbf16>
    %c0_6 = arith.constant 0 : index
    %c0_7 = arith.constant 0 : index
    %13 = vector.load %arg4[%c0_6, %c0_7] : memref<512x48xbf16, #tpu.memory_space<vmem>>, vector<512x48xbf16>
    tpu.vector_store %arg4[%c0_6, %c0_7], %12 {strides = array<i32>} : memref<512x48xbf16, #tpu.memory_space<vmem>>, vector<512x48xbf16>,
    return
  }
  func.func @transform_0(%arg0: i32) -> (i32, i32) {
    %c0_i32 = arith.constant 0 : i32
    %c0_i32_0 = arith.constant 0 : i32
    return %arg0, %c0_i32 : i32, i32
  }
  func.func @transform_1(%arg0: i32) -> (i32, i32) {
    %c0_i32 = arith.constant 0 : i32
    %c0_i32_0 = arith.constant 0 : i32
    %c0_i32_1 = arith.constant 0 : i32
    return %c0_i32, %c0_i32_0 : i32, i32
  }
  func.func @transform_2(%arg0: i32) -> (i32, i32) {
    %c0_i32 = arith.constant 0 : i32
    %c0_i32_0 = arith.constant 0 : i32
    %c0_i32_1 = arith.constant 0 : i32
    return %c0_i32, %c0_i32_0 : i32, i32
  }
  func.func @transform_3(%arg0: i32) -> (i32, i32) {
    %c0_i32 = arith.constant 0 : i32
    %c0_i32_0 = arith.constant 0 : i32
    return %arg0, %c0_i32 : i32, i32
  }
}

</mosaic_0001>

<bundles_post_ra>
// kernel: tpu_custom_call.1
= control target key start
LH: loop header
LB: loop body
LE: loop exit
PB: predicated region body
PF: predicated region fallthrough
CT: control target
= control target key end

     0   :  { %s2736_s12 = smov 0   ;;  %s4191_s0 = inlined_call_operand.vmem [shape: bf16[2048,27], index: 0, kind: input, shape index: {}]   ;;  %s4192_s1 = inlined_call_operand.vmem [shape: bf16[27,48], index: 1, kind: input, shape index: {}]   ;;  %s4193_s2 = inlined_call_operand.vmem [shape: f32[1,48], index: 2, kind: input, shape index: {}]   ;;  %s4194_s3 = inlined_call_operand.vmem [shape: bf16[2048,48], index: 3, kind: output, shape index: {}]  }
   0x1 LB: > { %s2156_s13 = sadd.s32 4294967295, %s2713_s12   ;;  %p2160_p0 = scmp.ge.s32.totalorder %s2713_s12, 1  ;;  %s2713_s12 = sphi %s2736_s12, %s13_s12  }
   0x2   : > { %p138_p1 = scmp.lt.s32.totalorder %s2713_s12, 5 }
   0x4   : > { %p139_p2 = pnand %p2160_p0, %p138_p1 }
   0x5   : > { %s2161_s18 = sshll.u32 (!%p139_p2), %s2156_s13, 6 }
   0x6   : > { %142 = sbr.rel (%p139_p2) target bundleno = 479 (0x1df), region = 32  ;;  %p163_p3 = scmp.lt.s32.totalorder (!%p139_p2), %s2161_s18, 255 }
   0xb   : > { %v2299_v0 = vld [vmem:[%s4192_s1 + $0x8] sm:$0xf]  ;;  %v2432_v1 = vld [vmem:[%s4192_s1 + $0x8] sm:$0x30]  ;;  %vm515_vm0 = vcmask 1044480   ;;  %vm516_vm1 = vcmask 1045504  }
   0xc   : > { %v2300_v2 = vor.u32 %v2432_v1, %v2299_v0  ;;  %v2715_v3 = vmov 65535   ;;  %s4294_s18 = smov (!%p163_p3, %s2161_s18), 255  ;;  %v2431_v7 = vld [vmem:[%s4192_s1] sm:$0xff]  ;;  %vm418_vm2 = vcmask 220160   ;;  %vm2035_vm8 = vcmask 388096  }
   0xd   : > { %v517_v4 = vsel %vm515_vm0, 4294967295, %v2715_v3  ;;  %s2162_s21 = sshll.u32 %s4294_s18, 2  ;;  %v2830_v40 = vld [vmem:[%s4193_s2] ss:$0 sm:$0xff] }
   0xe   : > { %v518_v5 = vsel %vm516_vm1, %v517_v4, 0  ;;  %s2761_s24 = scalar_lea.vmem %s4191_s0, %s2162_s21  ;;  %s2946_s29 = scalar_lea.vmem %s4194_s3, %s2162_s21 }
   0xf   : > { %v520_v6 = vand.u32 %v2300_v2, %v518_v5  ;;  %v2399_v8 = vld [vmem:[%s2761_s24] sm:$0xff]  ;;  %v2400_v12 = vld [vmem:[%s2761_s24 + $0x8] sm:$0xff]  ;;  %v2401_v16 = vld [vmem:[%s2761_s24 + $0x10] sm:$0xff] }
  0x10   : > { %v2407_v9 = vld [vmem:[%s2761_s24 + $0x40] sm:$0xff]  ;;  %v2408_v13 = vld [vmem:[%s2761_s24 + $0x48] sm:$0xff]  ;;  %v2409_v17 = vld [vmem:[%s2761_s24 + $0x50] sm:$0xff] }
  0x11   : > { %528 = vmatpush.bf16.msra.mxu0 %v520_v6  ;;  %2433 = vmatpush.bf16.msra.mxu1 %v520_v6  ;;  %v2415_v10 = vld [vmem:[%s2761_s24 + $0x80] sm:$0xff]  ;;  %v2416_v14 = vld [vmem:[%s2761_s24 + $0x88] sm:$0xff]  ;;  %v2417_v18 = vld [vmem:[%s2761_s24 + $0x90] sm:$0xff] }
  0x12   : > { %2434 = vmatpush.bf16.msra.mxu2 %v520_v6  ;;  %2435 = vmatpush.bf16.msra.mxu3 %v520_v6  ;;  %v2423_v11 = vld [vmem:[%s2761_s24 + $0xc0] sm:$0xff]  ;;  %v2424_v15 = vld [vmem:[%s2761_s24 + $0xc8] sm:$0xff]  ;;  %v2425_v19 = vld [vmem:[%s2761_s24 + $0xd0] sm:$0xff] }
  0x13   : > { %v2402_v20 = vld [vmem:[%s2761_s24 + $0x18] sm:$0xff]  ;;  %v2403_v24 = vld [vmem:[%s2761_s24 + $0x20] sm:$0xff]  ;;  %v2404_v28 = vld [vmem:[%s2761_s24 + $0x28] sm:$0xff] }
  0x14   : > { %v2410_v21 = vld [vmem:[%s2761_s24 + $0x58] sm:$0xff]  ;;  %v2411_v25 = vld [vmem:[%s2761_s24 + $0x60] sm:$0xff]  ;;  %v2412_v29 = vld [vmem:[%s2761_s24 + $0x68] sm:$0xff] }
  0x15   : > { %529 = vmatpush.bf16.msra.mxu0 %v2431_v7  ;;  %2436 = vmatpush.bf16.msra.mxu1 %v2431_v7  ;;  %v2418_v22 = vld [vmem:[%s2761_s24 + $0x98] sm:$0xff]  ;;  %v2419_v26 = vld [vmem:[%s2761_s24 + $0xa0] sm:$0xff]  ;;  %v2420_v30 = vld [vmem:[%s2761_s24 + $0xa8] sm:$0xff] }
  0x16   : > { %2437 = vmatpush.bf16.msra.mxu2 %v2431_v7  ;;  %2438 = vmatpush.bf16.msra.mxu3 %v2431_v7  ;;  %v2426_v23 = vld [vmem:[%s2761_s24 + $0xd8] sm:$0xff]  ;;  %v2427_v27 = vld [vmem:[%s2761_s24 + $0xe0] sm:$0xff]  ;;  %v2428_v31 = vld [vmem:[%s2761_s24 + $0xe8] sm:$0xff] }
  0x17   : > { %v2405_v32 = vld [vmem:[%s2761_s24 + $0x30] sm:$0xff]  ;;  %v2406_v36 = vld [vmem:[%s2761_s24 + $0x38] sm:$0xff] }
  0x18   : > { %2301 = vmatmul.msk.bf16.vlgmr.msra.gmra.mxu0 %vm418_vm2, %v2399_v8  ;;  %2309 = vmatmul.msk.bf16.vlgmr.msra.gmra.mxu1 %vm418_vm2, %v2407_v9  ;;  %v2413_v33 = vld [vmem:[%s2761_s24 + $0x70] sm:$0xff]  ;;  %v2414_v37 = vld [vmem:[%s2761_s24 + $0x78] sm:$0xff] }
  0x19   : > { %2317 = vmatmul.msk.bf16.vlgmr.msra.gmra.mxu2 %vm418_vm2, %v2415_v10  ;;  %2325 = vmatmul.msk.bf16.vlgmr.msra.gmra.mxu3 %vm418_vm2, %v2423_v11  ;;  %v2421_v34 = vld [vmem:[%s2761_s24 + $0xb0] sm:$0xff]  ;;  %v2422_v38 = vld [vmem:[%s2761_s24 + $0xb8] sm:$0xff] }
  0x1a   : > { %v2429_v35 = vld [vmem:[%s2761_s24 + $0xf0] sm:$0xff]  ;;  %v2430_v39 = vld [vmem:[%s2761_s24 + $0xf8] sm:$0xff] }
  0x28   : > { %2302 = vmatmul.msk.bf16.gmra.mxu0 %vm418_vm2, %v2400_v12  ;;  %2310 = vmatmul.msk.bf16.gmra.mxu1 %vm418_vm2, %v2408_v13 }
  0x29   : > { %2318 = vmatmul.msk.bf16.gmra.mxu2 %vm418_vm2, %v2416_v14  ;;  %2326 = vmatmul.msk.bf16.gmra.mxu3 %vm418_vm2, %v2424_v15 }
  0x38   : > { %2303 = vmatmul.msk.bf16.gmra.mxu0 %vm418_vm2, %v2401_v16  ;;  %2311 = vmatmul.msk.bf16.gmra.mxu1 %vm418_vm2, %v2409_v17 }
  0x39   : > { %2319 = vmatmul.msk.bf16.gmra.mxu2 %vm418_vm2, %v2417_v18  ;;  %2327 = vmatmul.msk.bf16.gmra.mxu3 %vm418_vm2, %v2425_v19 }
  0x48   : > { %2304 = vmatmul.msk.bf16.gmra.mxu0 %vm418_vm2, %v2402_v20  ;;  %2312 = vmatmul.msk.bf16.gmra.mxu1 %vm418_vm2, %v2410_v21 }
  0x49   : > { %2320 = vmatmul.msk.bf16.gmra.mxu2 %vm418_vm2, %v2418_v22  ;;  %2328 = vmatmul.msk.bf16.gmra.mxu3 %vm418_vm2, %v2426_v23 }
  0x58   : > { %2305 = vmatmul.msk.bf16.gmra.mxu0 %vm418_vm2, %v2403_v24  ;;  %2313 = vmatmul.msk.bf16.gmra.mxu1 %vm418_vm2, %v2411_v25 }
  0x59   : > { %2321 = vmatmul.msk.bf16.gmra.mxu2 %vm418_vm2, %v2419_v26  ;;  %2329 = vmatmul.msk.bf16.gmra.mxu3 %vm418_vm2, %v2427_v27 }
  0x68   : > { %2306 = vmatmul.msk.bf16.gmra.mxu0 %vm418_vm2, %v2404_v28  ;;  %2314 = vmatmul.msk.bf16.gmra.mxu1 %vm418_vm2, %v2412_v29 }
  0x69   : > { %2322 = vmatmul.msk.bf16.gmra.mxu2 %vm418_vm2, %v2420_v30  ;;  %2330 = vmatmul.msk.bf16.gmra.mxu3 %vm418_vm2, %v2428_v31 }
  0x78   : > { %2307 = vmatmul.msk.bf16.gmra.mxu0 %vm418_vm2, %v2405_v32  ;;  %2315 = vmatmul.msk.bf16.gmra.mxu1 %vm418_vm2, %v2413_v33 }
  0x79   : > { %2323 = vmatmul.msk.bf16.gmra.mxu2 %vm418_vm2, %v2421_v34  ;;  %2331 = vmatmul.msk.bf16.gmra.mxu3 %vm418_vm2, %v2429_v35 }
  0x88   : > { %2308 = vmatmul.msk.bf16.gmra.mxu0 %vm418_vm2, %v2406_v36  ;;  %2316 = vmatmul.msk.bf16.gmra.mxu1 %vm418_vm2, %v2414_v37 }
  0x89   : > { %2324 = vmatmul.msk.bf16.gmra.mxu2 %vm418_vm2, %v2422_v38  ;;  %2332 = vmatmul.msk.bf16.gmra.mxu3 %vm418_vm2, %v2430_v39 }
  0x95   : > { %v531_v41 = vpop.f32.mrf.mxu0  ;;  %v571_v42 = vpop.f32.mrf.mxu1 }
  0x96   : > { %v2833_v43 = vadd.f32 %v2830_v40, %v531_v41  ;;  %v2836_v44 = vadd.f32 %v2830_v40, %v571_v42 }
  0x98   : > { %v2333_v45 = vmul.f32 -1.442695, %v2833_v43  ;;  %v2349_v46 = vmul.f32 -1.442695, %v2836_v44 }
  0x9a   : > { %2449 = vpow2.f32 %v2333_v45 }
  0x9b   : > { %2451 = vpow2.f32 %v2349_v46 }
  0x9c   : > { %v611_v47 = vpop.f32.mrf.mxu2  ;;  %v651_v48 = vpop.f32.mrf.mxu3 }
  0x9d   : > { %v2841_v49 = vadd.f32 %v2830_v40, %v611_v47  ;;  %v2844_v50 = vadd.f32 %v2830_v40, %v651_v48  ;;  %v533_v51 = vpop.f32.mrf.mxu0  ;;  %v573_v52 = vpop.f32.mrf.mxu1 }
  0x9e   : > { %v2847_v53 = vadd.f32 %v2830_v40, %v533_v51  ;;  %v2850_v54 = vadd.f32 %v2830_v40, %v573_v52 }
  0x9f   : > { %v2365_v55 = vmul.f32 -1.442695, %v2841_v49  ;;  %v2381_v56 = vmul.f32 -1.442695, %v2844_v50 }
  0xa0   : > { %v2450_v57 = vpop.eup %2449  ;;  %v2334_v60 = vmul.f32 -1.442695, %v2847_v53  ;;  %v2350_v62 = vmul.f32 -1.442695, %v2850_v54 }
  0xa1   : > { %v2452_v58 = vpop.eup %2451  ;;  %v2854_v59 = vadd.f32 1.0, %v2450_v57  ;;  %2453 = vpow2.f32 %v2365_v55 }
  0xa2   : > { %v2857_v61 = vadd.f32 1.0, %v2452_v58  ;;  %2455 = vpow2.f32 %v2381_v56 }
  0xa3   : > { %2457 = vrcp.f32 %v2854_v59  ;;  %v956_v3 = vand.u32 2147483647, %v2854_v59  ;;  %v958_v4 = vand.u32 2147483648, %v2854_v59  ;;  %vm952_vm3 = vweird.f32 %v2854_v59 }
  0xa4   : > { %2459 = vrcp.f32 %v2857_v61  ;;  %v613_v63 = vpop.f32.mrf.mxu2  ;;  %v653_v0 = vpop.f32.mrf.mxu3  ;;  %v1196_v7 = vand.u32 2147483647, %v2857_v61  ;;  %v1198_v11 = vand.u32 2147483648, %v2857_v61  ;;  %vm1192_vm4 = vweird.f32 %v2857_v61 }
  0xa5   : > { %2461 = vpow2.f32 %v2334_v60  ;;  %v2863_v1 = vadd.f32 %v2830_v40, %v613_v63  ;;  %v536_v2 = vpop.f32.mrf.mxu0  ;;  %v576_v5 = vpop.f32.mrf.mxu1  ;;  %v2870_v9 = vadd.f32 %v2830_v40, %v653_v0  ;;  %vm2886_vm5 = vcmp.eq.f32.partialorder %v956_v3, 8.507059e+37 }
  0xa6   : > { %2463 = vpow2.f32 %v2350_v62  ;;  %v2876_v13 = vadd.f32 %v2830_v40, %v536_v2  ;;  %v2883_v16 = vadd.f32 %v2830_v40, %v576_v5  ;;  %v959_v20 = vor.u32 1.1754944e-38, %v958_v4 }
  0xa7   : > { %v2454_v6 = vpop.eup %2453  ;;  %v2366_v8 = vmul.f32 -1.442695, %v2863_v1  ;;  %vm2892_vm6 = vcmp.eq.f32.partialorder %v1196_v7, 8.507059e+37  ;;  %v2382_v24 = vmul.f32 -1.442695, %v2870_v9  ;;  %v1199_v27 = vor.u32 1.1754944e-38, %v1198_v11 }
  0xa8   : > { %v2456_v10 = vpop.eup %2455  ;;  %v2873_v12 = vadd.f32 1.0, %v2454_v6  ;;  %v2899_v28 = vmul.f32 -1.442695, %v2876_v13  ;;  %v2903_v31 = vmul.f32 -1.442695, %v2883_v16 }
  0xa9   : > { %v2458_v14 = vpop.eup %2457  ;;  %v2880_v15 = vadd.f32 1.0, %v2456_v10 }
  0xaa   : > { %v2460_v17 = vpop.eup %2459  ;;  %v948_v18 = vmul.f32 %v2458_v14, %v2854_v59  ;;  %2465 = vrcp.f32 %v2873_v12  ;;  %vm953_vm7 = vweird.f32 %v2458_v14  ;;  %v1436_v30 = vand.u32 2147483647, %v2873_v12 }
  0xab   : > { %v2462_v21 = vpop.eup %2461  ;;  %v1188_v22 = vmul.f32 %v2460_v17, %v2857_v61  ;;  %2467 = vpow2.f32 %v2366_v8  ;;  %v1438_v33 = vand.u32 2147483648, %v2873_v12  ;;  %vm1193_vm9 = vweird.f32 %v2460_v17  ;;  %vm954_vm11 = vmor %vm952_vm3, %vm953_vm7 }
  0xac   : > { %v2464_v25 = vpop.eup %2463  ;;  %v949_v26 = vsub.f32 1.0, %v948_v18  ;;  %2469 = vrcp.f32 %v2880_v15  ;;  %v2906_v34 = vadd.f32 1.0, %v2462_v21  ;;  %v1676_v37 = vand.u32 2147483647, %v2880_v15  ;;  %v616_v48 = vpop.f32.mrf.mxu2  ;;  %vm1194_vm14 = vmor %vm1192_vm4, %vm1193_vm9 }
  0xad   : > { %v1189_v29 = vsub.f32 1.0, %v1188_v22  ;;  %v2908_v35 = vadd.f32 1.0, %v2464_v25  ;;  %2471 = vpow2.f32 %v2382_v24  ;;  %vm1432_vm10 = vweird.f32 %v2873_v12 }
  0xae   : > { %v950_v32 = vmul.f32 %v2458_v14, %v949_v26  ;;  %v1678_v41 = vand.u32 2147483648, %v2880_v15  ;;  %2473 = vrcp.f32 %v2906_v34  ;;  %vm2918_vm12 = vcmp.eq.f32.partialorder %v1436_v30, 8.507059e+37 }
  0xaf   : > { %v1190_v36 = vmul.f32 %v2460_v17, %v1189_v29  ;;  %vm1672_vm13 = vweird.f32 %v2880_v15  ;;  %v1439_v55 = vor.u32 1.1754944e-38, %v1438_v33  ;;  %v971_v56 = vand.u32 2147483647, %v2906_v34 }
  0xb0   : > { %v2466_v38 = vpop.eup %2465  ;;  %v951_v39 = vadd.f32 %v2458_v14, %v950_v32  ;;  %2475 = vrcp.f32 %v2908_v35  ;;  %vm2931_vm15 = vcmp.eq.f32.partialorder %v1676_v37, 8.507059e+37  ;;  %v1679_v0 = vor.u32 1.1754944e-38, %v1678_v41 }
  0xb1   : > { %v2468_v42 = vpop.eup %2467  ;;  %v1191_v45 = vadd.f32 %v2460_v17, %v1190_v36  ;;  %v1428_v46 = vmul.f32 %v2466_v38, %v2873_v12  ;;  %v2939_v2 = vadd.f32 %v2830_v40, %v616_v48  ;;  %vm1433_vm0 = vweird.f32 %v2466_v38 }
  0xb2   : > { %v2470_v51 = vpop.eup %2469  ;;  %v955_v52 = vsel %vm954_vm11, %v2458_v14, %v951_v39  ;;  %vm967_vm1 = vweird.f32 %v2906_v34  ;;  %v973_v8 = vand.u32 2147483648, %v2906_v34  ;;  %v2951_v10 = vadd.f32 1.0, %v2468_v42  ;;  %vm1434_vm4 = vmor %vm1432_vm10, %vm1433_vm0 }
  0xb3   : > { %v960_v57 = vsel %vm2886_vm5, %v959_v20, %v955_v52  ;;  %v1195_v58 = vsel %vm1194_vm14, %v2460_v17, %v1191_v45  ;;  %v1429_v59 = vsub.f32 1.0, %v1428_v46  ;;  %v1668_v60 = vmul.f32 %v2470_v51, %v2880_v15  ;;  %v2472_v3 = vpop.eup %2471  ;;  %v656_v52 = vpop.f32.mrf.mxu3 }
  0xb4   : > { %v1907_v63 = vmul.f32 %v960_v57, %v2833_v43  ;;  %v1200_v61 = vsel %vm2892_vm6, %v1199_v27, %v1195_v58  ;;  %v2474_v6 = vpop.eup %2473  ;;  %vm1673_vm2 = vweird.f32 %v2470_v51  ;;  %vm2954_vm3 = vcmp.eq.f32.partialorder %v971_v56, 8.507059e+37 }
  0xb5   : > { %v1923_v4 = vmul.f32 %v1200_v61, %v2836_v44  ;;  %v1430_v5 = vmul.f32 %v2466_v38, %v1429_v59  ;;  %v1669_v43 = vsub.f32 1.0, %v1668_v60  ;;  %v963_v18 = vmul.f32 %v2474_v6, %v2906_v34  ;;  %vm1674_vm6 = vmor %vm1672_vm13, %vm1673_vm2  ;;  %v538_v60 = vpop.f32.mrf.mxu0 }
  0xb6   : > { %v1971_v7 = vpack.c.bf16 %v1907_v63, %v1907_v63  ;;  %v2476_v19 = vpop.eup %2475  ;;  %vm1207_vm5 = vweird.f32 %v2908_v35  ;;  %v1211_v20 = vand.u32 2147483647, %v2908_v35  ;;  %2477 = vrcp.f32 %v2951_v10 }
  0xb7   : > { %v1987_v11 = vpack.c.bf16 %v1923_v4, %v1923_v4  ;;  %v1431_v14 = vadd.f32 %v2466_v38, %v1430_v5  ;;  %v1670_v17 = vmul.f32 %v2470_v51, %v1669_v43  ;;  %v2966_v21 = vadd.f32 1.0, %v2472_v3 }
  0xb8   : > { %2036 = vst.msk [vmem:[%s2946_s29] sm:$0xf] %vm2035_vm8, %v1971_v7  ;;  %v964_v24 = vsub.f32 1.0, %v963_v18  ;;  %v1203_v25 = vmul.f32 %v2476_v19, %v2908_v35  ;;  %vm968_vm7 = vweird.f32 %v2474_v6  ;;  %vm1208_vm9 = vweird.f32 %v2476_v19 }
  0xb9   : > { %2052 = vst.msk [vmem:[%s2946_s29 + $0x40] sm:$0xf] %vm2035_vm8, %v1987_v11  ;;  %v1435_v22 = vsel %vm1434_vm4, %v2466_v38, %v1431_v14  ;;  %v1671_v23 = vadd.f32 %v2470_v51, %v1670_v17  ;;  %v1213_v12 = vand.u32 2147483648, %v2908_v35  ;;  %v1451_v36 = vand.u32 2147483647, %v2951_v10  ;;  %vm969_vm10 = vmor %vm967_vm1, %vm968_vm7 }
  0xba   : > { %v1440_v26 = vsel %vm2918_vm12, %v1439_v55, %v1435_v22  ;;  %v965_v30 = vmul.f32 %v2474_v6, %v964_v24  ;;  %v1204_v32 = vsub.f32 1.0, %v1203_v25  ;;  %v1453_v37 = vand.u32 2147483648, %v2951_v10  ;;  %vm1209_vm13 = vmor %vm1207_vm5, %vm1208_vm9 }
  0xbb   : > { %v1939_v27 = vmul.f32 %v1440_v26, %v2841_v49  ;;  %v1675_v29 = vsel %vm1674_vm6, %v2470_v51, %v1671_v23  ;;  %2479 = vrcp.f32 %v2966_v21  ;;  %v974_v49 = vor.u32 1.1754944e-38, %v973_v8 }
  0xbc   : > { %v1680_v33 = vsel %vm2931_vm15, %v1679_v0, %v1675_v29  ;;  %v966_v39 = vadd.f32 %v2474_v6, %v965_v30  ;;  %v1205_v41 = vmul.f32 %v2476_v19, %v1204_v32  ;;  %v2478_v42 = vpop.eup %2477  ;;  %vm2987_vm11 = vcmp.eq.f32.partialorder %v1211_v20, 8.507059e+37  ;;  %v578_v0 = vpop.f32.mrf.mxu1 }
  0xbd   : > { %v2003_v15 = vpack.c.bf16 %v1939_v27, %v1939_v27  ;;  %v1955_v38 = vmul.f32 %v1680_v33, %v2844_v50  ;;  %v1214_v46 = vor.u32 1.1754944e-38, %v1213_v12  ;;  %vm1447_vm12 = vweird.f32 %v2951_v10  ;;  %v658_v27 = vpop.f32.mrf.mxu3 }
  0xbe   : > { %v970_v50 = vsel %vm969_vm10, %v2474_v6, %v966_v39  ;;  %v1206_v48 = vadd.f32 %v2476_v19, %v1205_v41  ;;  %v1443_v51 = vmul.f32 %v2478_v42, %v2951_v10  ;;  %vm1448_vm14 = vweird.f32 %v2478_v42 }
  0xbf   : > { %2068 = vst.msk [vmem:[%s2946_s29 + $0x80] sm:$0xf] %vm2035_vm8, %v2003_v15  ;;  %v2019_v47 = vpack.c.bf16 %v1955_v38, %v1955_v38  ;;  %v975_v34 = vsel %vm2954_vm3, %v974_v49, %v970_v50  ;;  %vm3000_vm15 = vcmp.eq.f32.partialorder %v1451_v36, 8.507059e+37  ;;  %v1454_v56 = vor.u32 1.1754944e-38, %v1453_v37  ;;  %vm1449_vm1 = vmor %vm1447_vm12, %vm1448_vm14  ;;  %v541_v36 = vpop.f32.mrf.mxu0 }
  0xc0   : > { %v1908_v57 = vmul.f32 %v975_v34, %v2847_v53  ;;  %v1210_v58 = vsel %vm1209_vm13, %v2476_v19, %v1206_v48  ;;  %v1444_v59 = vsub.f32 1.0, %v1443_v51  ;;  %2481 = vpow2.f32 %v2899_v28 }
  0xc1   : > { %2084 = vst.msk [vmem:[%s2946_s29 + $0xc0] sm:$0xf] %vm2035_vm8, %v2019_v47  ;;  %v2480_v62 = vpop.eup %2479  ;;  %v1215_v35 = vsel %vm2987_vm11, %v1214_v46, %v1210_v58  ;;  %2483 = vpow2.f32 %v2903_v31  ;;  %v2367_v63 = vmul.f32 -1.442695, %v2939_v2  ;;  %v3013_v61 = vadd.f32 %v2830_v40, %v656_v52 }
  0xc2   : > { %v1972_v3 = vpack.c.bf16 %v1908_v57, %v1908_v57  ;;  %v1924_v53 = vmul.f32 %v1215_v35, %v2850_v54  ;;  %v1445_v4 = vmul.f32 %v2478_v42, %v1444_v59  ;;  %v1683_v28 = vmul.f32 %v2480_v62, %v2966_v21  ;;  %v618_v54 = vpop.f32.mrf.mxu2 }
  0xc3   : > { %vm1687_vm0 = vweird.f32 %v2966_v21  ;;  %2485 = vpow2.f32 %v2367_v63  ;;  %v2383_v5 = vmul.f32 -1.442695, %v3013_v61  ;;  %v3020_v31 = vadd.f32 %v2830_v40, %v538_v60 }
  0xc4   : > { %2037 = vst.msk [vmem:[%s2946_s29 + $0x4] sm:$0xf] %vm2035_vm8, %v1972_v3  ;;  %v1988_v43 = vpack.c.bf16 %v1924_v53, %v1924_v53  ;;  %v1446_v6 = vadd.f32 %v2478_v42, %v1445_v4  ;;  %v1684_v7 = vsub.f32 1.0, %v1683_v28  ;;  %v3025_v8 = vadd.f32 %v2830_v40, %v578_v0 }
  0xc5   : > { %v1691_v11 = vand.u32 2147483647, %v2966_v21  ;;  %v1693_v14 = vand.u32 2147483648, %v2966_v21  ;;  %2487 = vpow2.f32 %v2383_v5  ;;  %v2336_v17 = vmul.f32 -1.442695, %v3020_v31 }
  0xc6   : > { %v2482_v18 = vpop.eup %2481  ;;  %2053 = vst.msk [vmem:[%s2946_s29 + $0x44] sm:$0xf] %vm2035_vm8, %v1988_v43  ;;  %v1450_v44 = vsel %vm1449_vm1, %v2478_v42, %v1446_v6  ;;  %v1685_v19 = vmul.f32 %v2480_v62, %v1684_v7  ;;  %vm1688_vm2 = vweird.f32 %v2480_v62  ;;  %v2352_v20 = vmul.f32 -1.442695, %v3025_v8 }
  0xc7   : > { %v2484_v22 = vpop.eup %2483  ;;  %v1455_v10 = vsel %vm3000_vm15, %v1454_v56, %v1450_v44  ;;  %v3038_v23 = vadd.f32 1.0, %v2482_v18  ;;  %2489 = vpow2.f32 %v2336_v17  ;;  %v3041_v24 = vadd.f32 %v2830_v40, %v618_v54  ;;  %vm1689_vm3 = vmor %vm1687_vm0, %vm1688_vm2 }
  0xc8   : > { %v1940_v25 = vmul.f32 %v1455_v10, %v2863_v1  ;;  %v1686_v26 = vadd.f32 %v2480_v62, %v1685_v19  ;;  %v3044_v12 = vadd.f32 1.0, %v2484_v22  ;;  %2491 = vpow2.f32 %v2352_v20 }
  0xc9   : > { %v2486_v29 = vpop.eup %2485  ;;  %v1694_v30 = vor.u32 1.1754944e-38, %v1693_v14  ;;  %2493 = vrcp.f32 %v3038_v23  ;;  %vm1692_vm4 = vcmp.eq.f32.partialorder %v1691_v11, 8.507059e+37  ;;  %v986_v15 = vand.u32 2147483647, %v3038_v23  ;;  %v661_v14 = vpop.f32.mrf.mxu3 }
  0xca   : > { %v2004_v32 = vpack.c.bf16 %v1940_v25, %v1940_v25  ;;  %v1690_v33 = vsel %vm1689_vm3, %v2480_v62, %v1686_v26  ;;  %2495 = vrcp.f32 %v3044_v12  ;;  %v2368_v38 = vmul.f32 -1.442695, %v3041_v24 }
  0xcb   : > { %v2488_v1 = vpop.eup %2487  ;;  %v1695_v37 = vsel %vm1692_vm4, %v1694_v30, %v1690_v33  ;;  %v3053_v39 = vadd.f32 %v2830_v40, %v658_v27  ;;  %v988_v41 = vand.u32 2147483648, %v3038_v23  ;;  %v3059_v42 = vadd.f32 1.0, %v2486_v29 }
  0xcc   : > { %2069 = vst.msk [vmem:[%s2946_s29 + $0x84] sm:$0xf] %vm2035_vm8, %v2004_v32  ;;  %v1956_v21 = vmul.f32 %v1695_v37, %v2870_v9  ;;  %v3061_v49 = vadd.f32 1.0, %v2488_v1  ;;  %v1226_v46 = vand.u32 2147483647, %v3044_v12  ;;  %v1228_v47 = vand.u32 2147483648, %v3044_v12 }
  0xcd   : > { %v2490_v45 = vpop.eup %2489  ;;  %v3066_v50 = vadd.f32 %v2830_v40, %v541_v36  ;;  %2497 = vrcp.f32 %v3059_v42  ;;  %vm982_vm5 = vweird.f32 %v3038_v23  ;;  %vm1222_vm6 = vweird.f32 %v3044_v12 }
  0xce   : > { %v2492_v48 = vpop.eup %2491  ;;  %v2020_v51 = vpack.c.bf16 %v1956_v21, %v1956_v21  ;;  %2499 = vrcp.f32 %v3061_v49  ;;  %v2384_v52 = vmul.f32 -1.442695, %v3053_v39  ;;  %vm3076_vm7 = vcmp.eq.f32.partialorder %v986_v15, 8.507059e+37 }
  0xcf   : > { %v2494_v9 = vpop.eup %2493  ;;  %v989_v57 = vor.u32 1.1754944e-38, %v988_v41  ;;  %2501 = vpow2.f32 %v2368_v38  ;;  %vm3081_vm9 = vcmp.eq.f32.partialorder %v1226_v46, 8.507059e+37  ;;  %v1229_v60 = vor.u32 1.1754944e-38, %v1228_v47 }
  0xd0   : > { %v2496_v34 = vpop.eup %2495  ;;  %2085 = vst.msk [vmem:[%s2946_s29 + $0xc4] sm:$0xf] %vm2035_vm8, %v2020_v51  ;;  %v978_v55 = vmul.f32 %v2494_v9, %v3038_v23  ;;  %v1466_v62 = vand.u32 2147483647, %v3059_v42  ;;  %v3087_v35 = vmul.f32 -1.442695, %v3066_v50  ;;  %vm1462_vm10 = vweird.f32 %v3059_v42  ;;  %v581_v51 = vpop.f32.mrf.mxu1 }
  0xd1   : > { %v1218_v58 = vmul.f32 %v2496_v34, %v3044_v12  ;;  %v1468_v0 = vand.u32 2147483648, %v3059_v42  ;;  %v1706_v3 = vand.u32 2147483647, %v3061_v49  ;;  %v3091_v53 = vadd.f32 1.0, %v2490_v45 }
  0xd2   : > { %v979_v63 = vsub.f32 1.0, %v978_v55  ;;  %v1708_v28 = vand.u32 2147483648, %v3061_v49  ;;  %v3095_v5 = vadd.f32 1.0, %v2492_v48  ;;  %2503 = vpow2.f32 %v2384_v52 }
  0xd3   : > { %v1219_v4 = vsub.f32 1.0, %v1218_v58  ;;  %v2498_v43 = vpop.eup %2497  ;;  %vm983_vm11 = vweird.f32 %v2494_v9  ;;  %vm1702_vm12 = vweird.f32 %v3061_v49  ;;  %2505 = vrcp.f32 %v3091_v53 }
  0xd4   : > { %v980_v6 = vmul.f32 %v2494_v9, %v979_v63  ;;  %v2500_v7 = vpop.eup %2499  ;;  %vm1223_vm13 = vweird.f32 %v2496_v34  ;;  %v1458_v11 = vmul.f32 %v2498_v43, %v3059_v42  ;;  %vm3100_vm14 = vcmp.eq.f32.partialorder %v1466_v62, 8.507059e+37  ;;  %vm984_vm0 = vmor %vm982_vm5, %vm983_vm11 }
  0xd5   : > { %v1220_v54 = vmul.f32 %v2496_v34, %v1219_v4  ;;  %v2502_v17 = vpop.eup %2501  ;;  %v1469_v44 = vor.u32 1.1754944e-38, %v1468_v0  ;;  %v1698_v19 = vmul.f32 %v2500_v7, %v3061_v49  ;;  %vm3105_vm15 = vcmp.eq.f32.partialorder %v1706_v3, 8.507059e+37  ;;  %vm1224_vm1 = vmor %vm1222_vm6, %vm1223_vm13 }
  0xd6   : > { %v981_v18 = vadd.f32 %v2494_v9, %v980_v6  ;;  %v1459_v10 = vsub.f32 1.0, %v1458_v11  ;;  %v1709_v25 = vor.u32 1.1754944e-38, %v1708_v28  ;;  %2507 = vrcp.f32 %v3095_v5 }
  0xd7   : > { %v1221_v22 = vadd.f32 %v2496_v34, %v1220_v54  ;;  %vm1463_vm2 = vweird.f32 %v2498_v43  ;;  %v1699_v27 = vsub.f32 1.0, %v1698_v19  ;;  %v1001_v29 = vand.u32 2147483647, %v3091_v53 }
  0xd8   : > { %v985_v26 = vsel %vm984_vm0, %v2494_v9, %v981_v18  ;;  %v2504_v30 = vpop.eup %2503  ;;  %v1460_v23 = vmul.f32 %v2498_v43, %v1459_v10  ;;  %v1003_v36 = vand.u32 2147483648, %v3091_v53  ;;  %vm1703_vm3 = vweird.f32 %v2500_v7  ;;  %vm1464_vm4 = vmor %vm1462_vm10, %vm1463_vm2  ;;  %v543_v10 = vpop.f32.mrf.mxu0 }
  0xd9   : > { %v990_v32 = vsel %vm3076_vm7, %v989_v57, %v985_v26  ;;  %v1225_v33 = vsel %vm1224_vm1, %v2496_v34, %v1221_v22  ;;  %v2506_v1 = vpop.eup %2505  ;;  %v1700_v12 = vmul.f32 %v2500_v7, %v1699_v27  ;;  %v1241_v45 = vand.u32 2147483647, %v3095_v5  ;;  %vm1704_vm5 = vmor %vm1702_vm12, %vm1703_vm3 }
  0xda   : > { %v1909_v37 = vmul.f32 %v990_v32, %v2876_v13  ;;  %v1230_v15 = vsel %vm3081_vm9, %v1229_v60, %v1225_v33  ;;  %v1461_v21 = vadd.f32 %v2498_v43, %v1460_v23  ;;  %v993_v41 = vmul.f32 %v2506_v1, %v3091_v53  ;;  %v621_v60 = vpop.f32.mrf.mxu2 }
  0xdb   : > { %v1925_v38 = vmul.f32 %v1230_v15, %v2883_v16  ;;  %v1701_v13 = vadd.f32 %v2500_v7, %v1700_v12  ;;  %v1243_v47 = vand.u32 2147483648, %v3095_v5  ;;  %v3128_v48 = vadd.f32 1.0, %v2502_v17 }
  0xdc   : > { %v1973_v46 = vpack.c.bf16 %v1909_v37, %v1909_v37  ;;  %v2508_v9 = vpop.eup %2507  ;;  %v1465_v52 = vsel %vm1464_vm4, %v2498_v43, %v1461_v21  ;;  %v994_v34 = vsub.f32 1.0, %v993_v41  ;;  %v3132_v55 = vadd.f32 1.0, %v2504_v30 }
  0xdd   : > { %v1989_v16 = vpack.c.bf16 %v1925_v38, %v1925_v38  ;;  %v1470_v42 = vsel %vm3100_vm14, %v1469_v44, %v1465_v52  ;;  %v1705_v56 = vsel %vm1704_vm5, %v2500_v7, %v1701_v13  ;;  %vm998_vm6 = vweird.f32 %v2506_v1 }
  0xde   : > { %2038 = vst.msk [vmem:[%s2946_s29 + $0x8] sm:$0xf] %vm2035_vm8, %v1973_v46  ;;  %v1233_v57 = vmul.f32 %v2508_v9, %v3095_v5  ;;  %v1941_v58 = vmul.f32 %v1470_v42, %v2939_v2  ;;  %v1710_v49 = vsel %vm3105_vm15, %v1709_v25, %v1705_v56  ;;  %v995_v59 = vmul.f32 %v2506_v1, %v994_v34  ;;  %v583_v25 = vpop.f32.mrf.mxu1 }
  0xdf   : > { %2054 = vst.msk [vmem:[%s2946_s29 + $0x48] sm:$0xf] %vm2035_vm8, %v1989_v16  ;;  %2509 = vrcp.f32 %v3128_v48  ;;  %v1957_v62 = vmul.f32 %v1710_v49, %v3013_v61  ;;  %vm997_vm7 = vweird.f32 %v3091_v53  ;;  %v3148_v0 = vadd.f32 %v2830_v40, %v581_v51 }
  0xe0   : > { %v1234_v63 = vsub.f32 1.0, %v1233_v57  ;;  %v2005_v3 = vpack.c.bf16 %v1941_v58, %v1941_v58  ;;  %v996_v4 = vadd.f32 %v2506_v1, %v995_v59  ;;  %vm1002_vm9 = vcmp.eq.f32.partialorder %v1001_v29, 8.507059e+37  ;;  %vm999_vm10 = vmor %vm997_vm7, %vm998_vm6 }
  0xe1   : > { %2511 = vrcp.f32 %v3132_v55  ;;  %v2021_v2 = vpack.c.bf16 %v1957_v62, %v1957_v62  ;;  %v1004_v28 = vor.u32 1.1754944e-38, %v1003_v36  ;;  %vm1238_vm11 = vweird.f32 %v2508_v9 }
  0xe2   : > { %v1235_v43 = vmul.f32 %v2508_v9, %v1234_v63  ;;  %2070 = vst.msk [vmem:[%s2946_s29 + $0x88] sm:$0xf] %vm2035_vm8, %v2005_v3  ;;  %v1000_v61 = vsel %vm999_vm10, %v2506_v1, %v996_v4  ;;  %vm1237_vm12 = vweird.f32 %v3095_v5  ;;  %vm3155_vm13 = vcmp.eq.f32.partialorder %v1241_v45, 8.507059e+37  ;;  %v623_v12 = vpop.f32.mrf.mxu2 }
  0xe3   : > { %v1244_v6 = vor.u32 1.1754944e-38, %v1243_v47  ;;  %2086 = vst.msk [vmem:[%s2946_s29 + $0xc8] sm:$0xf] %vm2035_vm8, %v2021_v2  ;;  %v1005_v7 = vsel %vm1002_vm9, %v1004_v28, %v1000_v61  ;;  %vm1477_vm14 = vweird.f32 %v3128_v48  ;;  %2513 = vpow2.f32 %v3087_v35  ;;  %vm1239_vm15 = vmor %vm1237_vm12, %vm1238_vm11 }
  0xe4   : > { %v1236_v54 = vadd.f32 %v2508_v9, %v1235_v43  ;;  %v2353_v11 = vmul.f32 -1.442695, %v3148_v0  ;;  %v1910_v18 = vmul.f32 %v1005_v7, %v3020_v31  ;;  %v1481_v5 = vand.u32 2147483647, %v3128_v48 }
  0xe5   : > { %v2510_v17 = vpop.eup %2509  ;;  %v1483_v44 = vand.u32 2147483648, %v3128_v48  ;;  %v3169_v19 = vadd.f32 %v2830_v40, %v621_v60  ;;  %v1721_v35 = vand.u32 2147483647, %v3132_v55  ;;  %v3177_v30 = vadd.f32 %v2830_v40, %v661_v14  ;;  %v663_v60 = vpop.f32.mrf.mxu3 }
  0xe6   : > { %v1240_v20 = vsel %vm1239_vm15, %v2508_v9, %v1236_v54  ;;  %v1473_v22 = vmul.f32 %v2510_v17, %v3128_v48  ;;  %2515 = vpow2.f32 %v2353_v11  ;;  %v1974_v31 = vpack.c.bf16 %v1910_v18, %v1910_v18 }
  0xe7   : > { %v2512_v26 = vpop.eup %2511  ;;  %v1245_v27 = vsel %vm3155_vm13, %v1244_v6, %v1240_v20  ;;  %v2369_v29 = vmul.f32 -1.442695, %v3169_v19  ;;  %v1723_v36 = vand.u32 2147483648, %v3132_v55  ;;  %v2385_v1 = vmul.f32 -1.442695, %v3177_v30 }
  0xe8   : > { %v1926_v32 = vmul.f32 %v1245_v27, %v3025_v8  ;;  %v1474_v33 = vsub.f32 1.0, %v1473_v22  ;;  %v1713_v23 = vmul.f32 %v2512_v26, %v3132_v55  ;;  %2039 = vst.msk [vmem:[%s2946_s29 + $0xc] sm:$0xf] %vm2035_vm8, %v1974_v31  ;;  %v3186_v37 = vadd.f32 %v2830_v40, %v543_v10 }
  0xe9   : > { %2517 = vpow2.f32 %v2369_v29  ;;  %v3189_v15 = vadd.f32 %v2830_v40, %v583_v25  ;;  %v2514_v38 = vpop.eup %2513  ;;  %vm1478_vm0 = vweird.f32 %v2510_v17  ;;  %vm1718_vm1 = vweird.f32 %v2512_v26 }
  0xea   : > { %v1990_v8 = vpack.c.bf16 %v1926_v32, %v1926_v32  ;;  %v1475_v21 = vmul.f32 %v2510_v17, %v1474_v33  ;;  %v1714_v41 = vsub.f32 1.0, %v1713_v23  ;;  %v3191_v45 = vadd.f32 1.0, %v2514_v38  ;;  %vm1479_vm2 = vmor %vm1477_vm14, %vm1478_vm0 }
  0xeb   : > { %2519 = vpow2.f32 %v2385_v1  ;;  %v2338_v46 = vmul.f32 -1.442695, %v3186_v37  ;;  %v2354_v13 = vmul.f32 -1.442695, %v3189_v15  ;;  %v3198_v16 = vadd.f32 %v2830_v40, %v623_v12 }
  0xec   : > { %v2516_v47 = vpop.eup %2515  ;;  %2055 = vst.msk [vmem:[%s2946_s29 + $0x4c] sm:$0xf] %vm2035_vm8, %v1990_v8  ;;  %v1476_v51 = vadd.f32 %v2510_v17, %v1475_v21  ;;  %v1715_v9 = vmul.f32 %v2512_v26, %v1714_v41  ;;  %vm1482_vm3 = vcmp.eq.f32.partialorder %v1481_v5, 8.507059e+37  ;;  %v1484_v52 = vor.u32 1.1754944e-38, %v1483_v44 }
  0xed   : > { %vm1717_vm4 = vweird.f32 %v3132_v55  ;;  %2521 = vrcp.f32 %v3191_v45  ;;  %v3204_v56 = vadd.f32 1.0, %v2516_v47  ;;  %vm1722_vm6 = vcmp.eq.f32.partialorder %v1721_v35, 8.507059e+37  ;;  %v666_v10 = vpop.f32.mrf.mxu3 }
  0xee   : > { %v1480_v34 = vsel %vm1479_vm2, %v2510_v17, %v1476_v51  ;;  %v1716_v42 = vadd.f32 %v2512_v26, %v1715_v9  ;;  %2523 = vpow2.f32 %v2338_v46  ;;  %vm1719_vm5 = vmor %vm1717_vm4, %vm1718_vm1  ;;  %v1724_v49 = vor.u32 1.1754944e-38, %v1723_v36 }
  0xef   : > { %v2518_v57 = vpop.eup %2517  ;;  %v1485_v58 = vsel %vm1482_vm3, %v1484_v52, %v1480_v34  ;;  %2525 = vpow2.f32 %v2354_v13  ;;  %v2370_v55 = vmul.f32 -1.442695, %v3198_v16  ;;  %v1016_v3 = vand.u32 2147483647, %v3191_v45 }
  0xf0   : > { %v1942_v48 = vmul.f32 %v1485_v58, %v3041_v24  ;;  %v1720_v59 = vsel %vm1719_vm5, %v2512_v26, %v1716_v42  ;;  %2527 = vrcp.f32 %v3204_v56  ;;  %v1018_v4 = vand.u32 2147483648, %v3191_v45 }
  0xf1   : > { %v2520_v62 = vpop.eup %2519  ;;  %v1725_v63 = vsel %vm1722_vm6, %v1724_v49, %v1720_v59  ;;  %v3211_v2 = vadd.f32 1.0, %v2518_v57  ;;  %v1256_v53 = vand.u32 2147483647, %v3204_v56  ;;  %v1258_v6 = vand.u32 2147483648, %v3204_v56 }
  0xf2   : > { %v2006_v28 = vpack.c.bf16 %v1942_v48, %v1942_v48  ;;  %v1958_v43 = vmul.f32 %v1725_v63, %v3053_v39  ;;  %v3214_v61 = vadd.f32 1.0, %v2520_v62  ;;  %v3220_v7 = vadd.f32 %v2830_v40, %v663_v60 }
  0xf3   : > { %v2522_v24 = vpop.eup %2521  ;;  %2529 = vrcp.f32 %v3211_v2  ;;  %vm1012_vm7 = vweird.f32 %v3191_v45  ;;  %vm3226_vm9 = vcmp.eq.f32.partialorder %v1016_v3, 8.507059e+37  ;;  %v1019_v18 = vor.u32 1.1754944e-38, %v1018_v4 }
  0xf4   : > { %v2524_v54 = vpop.eup %2523  ;;  %2071 = vst.msk [vmem:[%s2946_s29 + $0x8c] sm:$0xf] %vm2035_vm8, %v2006_v28  ;;  %v2022_v11 = vpack.c.bf16 %v1958_v43, %v1958_v43  ;;  %v1008_v14 = vmul.f32 %v2522_v24, %v3191_v45  ;;  %2531 = vpow2.f32 %v2370_v55  ;;  %v1496_v5 = vand.u32 2147483647, %v3211_v2 }
  0xf5   : > { %v2526_v39 = vpop.eup %2525  ;;  %2533 = vrcp.f32 %v3214_v61  ;;  %vm1252_vm10 = vweird.f32 %v3204_v56  ;;  %v1498_v20 = vand.u32 2147483648, %v3211_v2  ;;  %v3236_v22 = vadd.f32 1.0, %v2524_v54 }
  0xf6   : > { %v2528_v40 = vpop.eup %2527  ;;  %2087 = vst.msk [vmem:[%s2946_s29 + $0xcc] sm:$0xf] %vm2035_vm8, %v2022_v11  ;;  %v1009_v44 = vsub.f32 1.0, %v1008_v14  ;;  %vm3239_vm11 = vcmp.eq.f32.partialorder %v1256_v53, 8.507059e+37  ;;  %v1259_v25 = vor.u32 1.1754944e-38, %v1258_v6  ;;  %v1738_v26 = vand.u32 2147483648, %v3214_v61  ;;  %v626_v53 = vpop.f32.mrf.mxu2 }
  0xf7   : > { %v1248_v35 = vmul.f32 %v2528_v40, %v3204_v56  ;;  %vm1013_vm12 = vweird.f32 %v2522_v24  ;;  %v1736_v27 = vand.u32 2147483647, %v3214_v61  ;;  %2535 = vrcp.f32 %v3236_v22 }
  0xf8   : > { %v1010_v31 = vmul.f32 %v2522_v24, %v1009_v44  ;;  %vm1492_vm13 = vweird.f32 %v3211_v2  ;;  %v1033_v33 = vand.u32 2147483648, %v3236_v22  ;;  %v3248_v23 = vadd.f32 1.0, %v2526_v39  ;;  %vm1014_vm1 = vmor %vm1012_vm7, %vm1013_vm12 }
  0xf9   : > { %v2530_v29 = vpop.eup %2529  ;;  %v1249_v32 = vsub.f32 1.0, %v1248_v35  ;;  %vm1253_vm14 = vweird.f32 %v2528_v40  ;;  %vm3251_vm15 = vcmp.eq.f32.partialorder %v1496_v5, 8.507059e+37  ;;  %v1499_v8 = vor.u32 1.1754944e-38, %v1498_v20 }
  0xfa   : > { %v2532_v36 = vpop.eup %2531  ;;  %v1011_v1 = vadd.f32 %v2522_v24, %v1010_v31  ;;  %v1488_v12 = vmul.f32 %v2530_v29, %v3211_v2  ;;  %vm1732_vm0 = vweird.f32 %v3214_v61  ;;  %v1739_v46 = vor.u32 1.1754944e-38, %v1738_v26  ;;  %vm1254_vm5 = vmor %vm1252_vm10, %vm1253_vm14 }
  0xfb   : > { %v2534_v21 = vpop.eup %2533  ;;  %v1250_v41 = vmul.f32 %v2528_v40, %v1249_v32  ;;  %v1031_v13 = vand.u32 2147483647, %v3236_v22  ;;  %2537 = vrcp.f32 %v3248_v23  ;;  %vm1493_vm2 = vweird.f32 %v2530_v29 }
  0xfc   : > { %v1015_v47 = vsel %vm1014_vm1, %v2522_v24, %v1011_v1  ;;  %v1489_v51 = vsub.f32 1.0, %v1488_v12  ;;  %v1728_v9 = vmul.f32 %v2534_v21, %v3214_v61  ;;  %vm3262_vm3 = vcmp.eq.f32.partialorder %v1736_v27, 8.507059e+37  ;;  %v586_v24 = vpop.f32.mrf.mxu1  ;;  %v3318_v1 = vld [vmem:[%s4193_s2] ss:$0 sm:$0xff] }
  0xfd   : > { %v1020_v34 = vsel %vm3226_vm9, %v1019_v18, %v1015_v47  ;;  %v1251_v45 = vadd.f32 %v2528_v40, %v1250_v41  ;;  %vm1027_vm4 = vweird.f32 %v3236_v22  ;;  %v1034_v42 = vor.u32 1.1754944e-38, %v1033_v33  ;;  %v2536_v58 = vpop.eup %2535  ;;  %vm1494_vm9 = vmor %vm1492_vm13, %vm1493_vm2 }
  0xfe   : > { %v3269_v57 = vadd.f32 1.0, %v2532_v36  ;;  %v1911_v49 = vmul.f32 %v1020_v34, %v3066_v50  ;;  %v1490_v48 = vmul.f32 %v2530_v29, %v1489_v51  ;;  %v1729_v59 = vsub.f32 1.0, %v1728_v9  ;;  %v546_v50 = vpop.f32.mrf.mxu0  ;;  %v628_v52 = vpop.f32.mrf.mxu2 }
  0xff   : > { %vm1733_vm6 = vweird.f32 %v2534_v21  ;;  %v1255_v55 = vsel %vm1254_vm5, %v2528_v40, %v1251_v45  ;;  %v1023_v60 = vmul.f32 %v2536_v58, %v3236_v22  ;;  %vm3276_vm7 = vcmp.eq.f32.partialorder %v1031_v13, 8.507059e+37 }
 0x100   : > { %v1271_v63 = vand.u32 2147483647, %v3248_v23  ;;  %v1273_v3 = vand.u32 2147483648, %v3248_v23  ;;  %v1975_v4 = vpack.c.bf16 %v1911_v49, %v1911_v49  ;;  %v1260_v56 = vsel %vm3239_vm11, %v1259_v25, %v1255_v55  ;;  %vm1734_vm12 = vmor %vm1732_vm0, %vm1733_vm6 }
 0x101   : > { %v1491_v28 = vadd.f32 %v2530_v29, %v1490_v48  ;;  %v1730_v43 = vmul.f32 %v2534_v21, %v1729_v59  ;;  %v2538_v6 = vpop.eup %2537  ;;  %v1927_v54 = vmul.f32 %v1260_v56, %v3148_v0  ;;  %v1024_v11 = vsub.f32 1.0, %v1023_v60 }
 0x102   : > { %vm1267_vm10 = vweird.f32 %v3248_v23  ;;  %2539 = vrcp.f32 %v3269_v57  ;;  %2040 = vst.msk [vmem:[%s2946_s29 + $0x10] sm:$0xf] %vm2035_vm8, %v1975_v4  ;;  %vm1028_vm11 = vweird.f32 %v2536_v58  ;;  %v1263_v17 = vmul.f32 %v2538_v6, %v3248_v23  ;;  %v668_v4 = vpop.f32.mrf.mxu3 }
 0x103   : > { %v1495_v14 = vsel %vm1494_vm9, %v2530_v29, %v1491_v28  ;;  %v1731_v39 = vadd.f32 %v2534_v21, %v1730_v43  ;;  %v1991_v18 = vpack.c.bf16 %v1927_v54, %v1927_v54  ;;  %v1025_v2 = vmul.f32 %v2536_v58, %v1024_v11 }
 0x104   : > { %v1500_v0 = vsel %vm3251_vm15, %v1499_v8, %v1495_v14  ;;  %vm3298_vm13 = vcmp.eq.f32.partialorder %v1271_v63, 8.507059e+37  ;;  %v1264_v20 = vsub.f32 1.0, %v1263_v17  ;;  %v1274_v35 = vor.u32 1.1754944e-38, %v1273_v3  ;;  %vm1029_vm15 = vmor %vm1027_vm4, %vm1028_vm11  ;;  %v588_v23 = vpop.f32.mrf.mxu1 }
 0x105   : > { %v1943_v40 = vmul.f32 %v1500_v0, %v3169_v19  ;;  %v1735_v44 = vsel %vm1734_vm12, %v2534_v21, %v1731_v39  ;;  %2056 = vst.msk [vmem:[%s2946_s29 + $0x50] sm:$0xf] %vm2035_vm8, %v1991_v18  ;;  %v1026_v26 = vadd.f32 %v2536_v58, %v1025_v2  ;;  %vm1268_vm14 = vweird.f32 %v2538_v6 }
 0x106   : > { %v1740_v25 = vsel %vm3262_vm3, %v1739_v46, %v1735_v44  ;;  %v2386_v61 = vmul.f32 -1.442695, %v3220_v7  ;;  %v1265_v19 = vmul.f32 %v2538_v6, %v1264_v20  ;;  %vm1507_vm0 = vweird.f32 %v3269_v57  ;;  %vm1269_vm1 = vmor %vm1267_vm10, %vm1268_vm14  ;;  %v548_v13 = vpop.f32.mrf.mxu0 }
 0x107   : > { %v2007_v31 = vpack.c.bf16 %v1943_v40, %v1943_v40  ;;  %v1959_v27 = vmul.f32 %v1740_v25, %v3177_v30  ;;  %v1511_v29 = vand.u32 2147483647, %v3269_v57  ;;  %v1030_v33 = vsel %vm1029_vm15, %v2536_v58, %v1026_v26 }
 0x108   : > { %v2540_v32 = vpop.eup %2539  ;;  %v1513_v36 = vand.u32 2147483648, %v3269_v57  ;;  %2541 = vpow2.f32 %v2386_v61  ;;  %v3321_v30 = vadd.f32 %v3318_v1, %v546_v50  ;;  %v1035_v12 = vsel %vm3276_vm7, %v1034_v42, %v1030_v33 }
 0x109   : > { %2072 = vst.msk [vmem:[%s2946_s29 + $0x90] sm:$0xf] %vm2035_vm8, %v2007_v31  ;;  %v2023_v22 = vpack.c.bf16 %v1959_v27, %v1959_v27  ;;  %v1266_v38 = vadd.f32 %v2538_v6, %v1265_v19  ;;  %v1503_v8 = vmul.f32 %v2540_v32, %v3269_v57  ;;  %v1912_v21 = vmul.f32 %v1035_v12, %v3186_v37 }
 0x10a   : > { %vm1508_vm2 = vweird.f32 %v2540_v32  ;;  %v2339_v41 = vmul.f32 -1.442695, %v3321_v30  ;;  %v3334_v46 = vadd.f32 %v3318_v1, %v586_v24  ;;  %v3339_v9 = vadd.f32 %v3318_v1, %v626_v53 }
 0x10b   : > { %2088 = vst.msk [vmem:[%s2946_s29 + $0xd0] sm:$0xf] %vm2035_vm8, %v2023_v22  ;;  %v1270_v47 = vsel %vm1269_vm1, %v2538_v6, %v1266_v38  ;;  %v1504_v51 = vsub.f32 1.0, %v1503_v8  ;;  %v3342_v37 = vadd.f32 %v3318_v1, %v666_v10  ;;  %v1976_v34 = vpack.c.bf16 %v1912_v21, %v1912_v21  ;;  %vm1509_vm3 = vmor %vm1507_vm0, %vm1508_vm2 }
 0x10c   : > { %v1275_v45 = vsel %vm3298_vm13, %v1274_v35, %v1270_v47  ;;  %2543 = vpow2.f32 %v2339_v41  ;;  %v2355_v42 = vmul.f32 -1.442695, %v3334_v46  ;;  %v2371_v48 = vmul.f32 -1.442695, %v3339_v9  ;;  %v591_v33 = vpop.f32.mrf.mxu1 }
 0x10d   : > { %v1928_v58 = vmul.f32 %v1275_v45, %v3189_v15  ;;  %v1505_v49 = vmul.f32 %v2540_v32, %v1504_v51  ;;  %v2387_v59 = vmul.f32 -1.442695, %v3342_v37  ;;  %2041 = vst.msk [vmem:[%s2946_s29 + $0x14] sm:$0xf] %vm2035_vm8, %v1976_v34  ;;  %v3353_v60 = vadd.f32 %v3318_v1, %v548_v13 }
 0x10e   : > { %v2542_v55 = vpop.eup %2541  ;;  %2545 = vpow2.f32 %v2355_v42  ;;  %v3356_v62 = vadd.f32 %v3318_v1, %v588_v23  ;;  %v3359_v63 = vadd.f32 %v3318_v1, %v628_v52  ;;  %v1514_v56 = vor.u32 1.1754944e-38, %v1513_v36  ;;  %v551_v20 = vpop.f32.mrf.mxu0 }
 0x10f   : > { %v1992_v15 = vpack.c.bf16 %v1928_v58, %v1928_v58  ;;  %v1506_v3 = vadd.f32 %v2540_v32, %v1505_v49  ;;  %v3361_v50 = vadd.f32 1.0, %v2542_v55  ;;  %2547 = vpow2.f32 %v2371_v48 }
 0x110   : > { %2549 = vpow2.f32 %v2387_v59  ;;  %v2340_v28 = vmul.f32 -1.442695, %v3353_v60  ;;  %vm1512_vm4 = vcmp.eq.f32.partialorder %v1511_v29, 8.507059e+37  ;;  %v2356_v6 = vmul.f32 -1.442695, %v3356_v62 }
 0x111   : > { %2057 = vst.msk [vmem:[%s2946_s29 + $0x54] sm:$0xf] %vm2035_vm8, %v1992_v15  ;;  %v1510_v43 = vsel %vm1509_vm3, %v2540_v32, %v1506_v3  ;;  %2551 = vrcp.f32 %v3361_v50  ;;  %v3372_v54 = vadd.f32 %v3318_v1, %v668_v4  ;;  %v2372_v14 = vmul.f32 -1.442695, %v3359_v63 }
 0x112   : > { %v2544_v24 = vpop.eup %2543  ;;  %v1515_v53 = vsel %vm1512_vm4, %v1514_v56, %v1510_v43  ;;  %2553 = vpow2.f32 %v2340_v28  ;;  %v1751_v0 = vand.u32 2147483647, %v3361_v50  ;;  %v1753_v2 = vand.u32 2147483648, %v3361_v50 }
 0x113   : > { %v1944_v57 = vmul.f32 %v1515_v53, %v3198_v16  ;;  %v3375_v11 = vadd.f32 1.0, %v2544_v24  ;;  %v2388_v16 = vmul.f32 -1.442695, %v3372_v54  ;;  %vm1747_vm5 = vweird.f32 %v3361_v50 }
 0x114   : > { %v2546_v39 = vpop.eup %2545  ;;  %vm3394_vm6 = vcmp.eq.f32.partialorder %v1751_v0, 8.507059e+37  ;;  %v3401_v27 = vadd.f32 %v3318_v1, %v551_v20  ;;  %v1754_v32 = vor.u32 1.1754944e-38, %v1753_v2  ;;  %v3420_v45 = vadd.f32 %v3318_v1, %v591_v33 }
 0x115   : > { %v2548_v17 = vpop.eup %2547  ;;  %v2008_v18 = vpack.c.bf16 %v1944_v57, %v1944_v57  ;;  %2555 = vrcp.f32 %v3375_v11  ;;  %v3381_v40 = vadd.f32 1.0, %v2546_v39  ;;  %v1046_v26 = vand.u32 2147483647, %v3375_v11 }
 0x116   : > { %v2550_v5 = vpop.eup %2549  ;;  %v3383_v44 = vadd.f32 1.0, %v2548_v17  ;;  %2557 = vpow2.f32 %v2356_v6  ;;  %v1048_v31 = vand.u32 2147483648, %v3375_v11  ;;  %vm1042_vm7 = vweird.f32 %v3375_v11 }
 0x117   : > { %v2552_v35 = vpop.eup %2551  ;;  %2073 = vst.msk [vmem:[%s2946_s29 + $0x94] sm:$0xf] %vm2035_vm8, %v2008_v18  ;;  %v3388_v10 = vadd.f32 1.0, %v2550_v5  ;;  %2559 = vpow2.f32 %v2372_v14  ;;  %v1286_v22 = vand.u32 2147483647, %v3381_v40  ;;  %v1288_v12 = vand.u32 2147483648, %v3381_v40 }
 0x118   : > { %v1743_v25 = vmul.f32 %v2552_v35, %v3361_v50  ;;  %2561 = vrcp.f32 %v3381_v40  ;;  %v2554_v19 = vpop.eup %2553  ;;  %v1528_v38 = vand.u32 2147483648, %v3383_v44  ;;  %vm1748_vm9 = vweird.f32 %v2552_v35 }
 0x119   : > { %2563 = vrcp.f32 %v3383_v44  ;;  %vm3409_vm10 = vcmp.eq.f32.partialorder %v1046_v26, 8.507059e+37  ;;  %v1526_v47 = vand.u32 2147483647, %v3383_v44  ;;  %v1049_v23 = vor.u32 1.1754944e-38, %v1048_v31  ;;  %vm1749_vm13 = vmor %vm1747_vm5, %vm1748_vm9 }
 0x11a   : > { %v1744_v29 = vsub.f32 1.0, %v1743_v25  ;;  %2565 = vpow2.f32 %v2388_v16  ;;  %v3414_v52 = vadd.f32 1.0, %v2554_v19  ;;  %v3417_v34 = vmul.f32 -1.442695, %v3401_v27 }
 0x11b   : > { %v2556_v36 = vpop.eup %2555  ;;  %2567 = vrcp.f32 %v3388_v10  ;;  %vm1282_vm11 = vweird.f32 %v3381_v40  ;;  %vm1522_vm12 = vweird.f32 %v3383_v44  ;;  %vm3428_vm15 = vcmp.eq.f32.partialorder %v1286_v22, 8.507059e+37 }
 0x11c   : > { %v2558_v8 = vpop.eup %2557  ;;  %v1745_v21 = vmul.f32 %v2552_v35, %v1744_v29  ;;  %v1038_v41 = vmul.f32 %v2556_v36, %v3375_v11  ;;  %vm1043_vm14 = vweird.f32 %v2556_v36  ;;  %v1289_v15 = vor.u32 1.1754944e-38, %v1288_v12 }
 0x11d   : > { %v2560_v51 = vpop.eup %2559  ;;  %v1529_v3 = vor.u32 1.1754944e-38, %v1528_v38  ;;  %vm3435_vm0 = vcmp.eq.f32.partialorder %v1526_v47, 8.507059e+37  ;;  %vm1762_vm1 = vweird.f32 %v3388_v10  ;;  %v1766_v50 = vand.u32 2147483647, %v3388_v10  ;;  %vm1044_vm2 = vmor %vm1042_vm7, %vm1043_vm14 }
 0x11e   : > { %v2562_v42 = vpop.eup %2561  ;;  %v1746_v58 = vadd.f32 %v2552_v35, %v1745_v21  ;;  %v1039_v49 = vsub.f32 1.0, %v1038_v41  ;;  %2569 = vrcp.f32 %v3414_v52  ;;  %v3444_v14 = vadd.f32 1.0, %v2558_v8 }
 0x11f   : > { %v2564_v48 = vpop.eup %2563  ;;  %v1278_v59 = vmul.f32 %v2562_v42, %v3381_v40  ;;  %vm1283_vm3 = vweird.f32 %v2562_v42  ;;  %v1768_v5 = vand.u32 2147483648, %v3388_v10  ;;  %v1061_v61 = vand.u32 2147483647, %v3414_v52 }
 0x120   : > { %v3432_v4 = vpop.eup %2565  ;;  %v1750_v56 = vsel %vm1749_vm13, %v2552_v35, %v1746_v58  ;;  %v1040_v28 = vmul.f32 %v2556_v36, %v1039_v49  ;;  %v1518_v43 = vmul.f32 %v2564_v48, %v3383_v44  ;;  %vm1523_vm4 = vweird.f32 %v2564_v48 }
 0x121   : > { %v2568_v53 = vpop.eup %2567  ;;  %v1755_v6 = vsel %vm3394_vm6, %v1754_v32, %v1750_v56  ;;  %v1279_v57 = vsub.f32 1.0, %v1278_v59  ;;  %vm1284_vm6 = vmor %vm1282_vm11, %vm1283_vm3  ;;  %2571 = vrcp.f32 %v3444_v14  ;;  %vm3464_vm9 = vcmp.eq.f32.partialorder %v1766_v50, 8.507059e+37 }
 0x122   : > { %v1960_v39 = vmul.f32 %v1755_v6, %v3220_v7  ;;  %v1041_v17 = vadd.f32 %v2556_v36, %v1040_v28  ;;  %v1519_v18 = vsub.f32 1.0, %v1518_v43  ;;  %v1758_v0 = vmul.f32 %v2568_v53, %v3388_v10  ;;  %vm1524_vm7 = vmor %vm1522_vm12, %vm1523_vm4 }
 0x123   : > { %v1280_v2 = vmul.f32 %v2562_v42, %v1279_v57  ;;  %vm1763_vm5 = vweird.f32 %v2568_v53  ;;  %v1063_v41 = vand.u32 2147483648, %v3414_v52  ;;  %vm1057_vm11 = vweird.f32 %v3414_v52 }
 0x124   : > { %v2024_v16 = vpack.c.bf16 %v1960_v39, %v1960_v39  ;;  %v1045_v20 = vsel %vm1044_vm2, %v2556_v36, %v1041_v17  ;;  %v1520_v35 = vmul.f32 %v2564_v48, %v1519_v18  ;;  %v1759_v25 = vsub.f32 1.0, %v1758_v0  ;;  %v2570_v29 = vpop.eup %2569  ;;  %v671_v17 = vpop.f32.mrf.mxu3 }
 0x125   : > { %v1050_v7 = vsel %vm3409_vm10, %v1049_v23, %v1045_v20  ;;  %v1281_v26 = vadd.f32 %v2562_v42, %v1280_v2  ;;  %v1769_v36 = vor.u32 1.1754944e-38, %v1768_v5  ;;  %vm1764_vm10 = vmor %vm1762_vm1, %vm1763_vm5  ;;  %v1053_v44 = vmul.f32 %v2570_v29, %v3414_v52  ;;  %v553_v18 = vpop.f32.mrf.mxu0 }
 0x126   : > { %2089 = vst.msk [vmem:[%s2946_s29 + $0xd4] sm:$0xf] %vm2035_vm8, %v2024_v16  ;;  %v1913_v11 = vmul.f32 %v1050_v7, %v3321_v30  ;;  %v1521_v31 = vadd.f32 %v2564_v48, %v1520_v35  ;;  %v1760_v19 = vmul.f32 %v2568_v53, %v1759_v25  ;;  %v3468_v30 = vadd.f32 1.0, %v2560_v51 }
 0x127   : > { %v1285_v32 = vsel %vm1284_vm6, %v2562_v42, %v1281_v26  ;;  %vm3484_vm12 = vcmp.eq.f32.partialorder %v1061_v61, 8.507059e+37  ;;  %v1054_v23 = vsub.f32 1.0, %v1053_v44  ;;  %v2572_v42 = vpop.eup %2571  ;;  %vm1058_vm13 = vweird.f32 %v2570_v29 }
 0x128   : > { %v1977_v40 = vpack.c.bf16 %v1913_v11, %v1913_v11  ;;  %v1290_v22 = vsel %vm3428_vm15, %v1289_v15, %v1285_v32  ;;  %v1525_v12 = vsel %vm1524_vm7, %v2564_v48, %v1521_v31  ;;  %v1761_v38 = vadd.f32 %v2568_v53, %v1760_v19  ;;  %vm1059_vm15 = vmor %vm1057_vm11, %vm1058_vm13  ;;  %v593_v19 = vpop.f32.mrf.mxu1 }
 0x129   : > { %v1929_v8 = vmul.f32 %v1290_v22, %v3334_v46  ;;  %v1530_v21 = vsel %vm3435_vm0, %v1529_v3, %v1525_v12  ;;  %2573 = vrcp.f32 %v3468_v30  ;;  %v1303_v48 = vand.u32 2147483648, %v3444_v14 }
 0x12a   : > { %2042 = vst.msk [vmem:[%s2946_s29 + $0x18] sm:$0xf] %vm2035_vm8, %v1977_v40  ;;  %v1945_v13 = vmul.f32 %v1530_v21, %v3339_v9  ;;  %v1765_v47 = vsel %vm1764_vm10, %v2568_v53, %v1761_v38  ;;  %v1301_v9 = vand.u32 2147483647, %v3444_v14  ;;  %v1055_v59 = vmul.f32 %v2570_v29, %v1054_v23 }
 0x12b   : > { %v1993_v51 = vpack.c.bf16 %v1929_v8, %v1929_v8  ;;  %v1770_v10 = vsel %vm3464_vm9, %v1769_v36, %v1765_v47  ;;  %v1064_v55 = vor.u32 1.1754944e-38, %v1063_v41  ;;  %v1293_v15 = vmul.f32 %v2572_v42, %v3444_v14 }
 0x12c   : > { %v2009_v58 = vpack.c.bf16 %v1945_v13, %v1945_v13  ;;  %v1961_v49 = vmul.f32 %v1770_v10, %v3342_v37  ;;  %vm1297_vm14 = vweird.f32 %v3444_v14  ;;  %v3501_v56 = vadd.f32 1.0, %v3432_v4  ;;  %v631_v37 = vpop.f32.mrf.mxu2  ;;  %v673_v53 = vpop.f32.mrf.mxu3 }
 0x12d   : > { %2058 = vst.msk [vmem:[%s2946_s29 + $0x58] sm:$0xf] %vm2035_vm8, %v1993_v51  ;;  %2575 = vpow2.f32 %v3417_v34  ;;  %v1056_v28 = vadd.f32 %v2570_v29, %v1055_v59  ;;  %v1294_v43 = vsub.f32 1.0, %v1293_v15  ;;  %v1541_v24 = vand.u32 2147483647, %v3468_v30 }
 0x12e   : > { %2074 = vst.msk [vmem:[%s2946_s29 + $0x98] sm:$0xf] %vm2035_vm8, %v2009_v58  ;;  %v2025_v3 = vpack.c.bf16 %v1961_v49, %v1961_v49  ;;  %v2357_v50 = vmul.f32 -1.442695, %v3420_v45  ;;  %vm1298_vm0 = vweird.f32 %v2572_v42  ;;  %vm3510_vm1 = vcmp.eq.f32.partialorder %v1301_v9, 8.507059e+37 }
 0x12f   : > { %v1304_v4 = vor.u32 1.1754944e-38, %v1303_v48  ;;  %2577 = vrcp.f32 %v3501_v56  ;;  %v2574_v34 = vpop.eup %2573  ;;  %v1060_v6 = vsel %vm1059_vm15, %v2570_v29, %v1056_v28  ;;  %v1295_v57 = vmul.f32 %v2572_v42, %v1294_v43  ;;  %vm1299_vm4 = vmor %vm1297_vm14, %vm1298_vm0 }
 0x130   : > { %2090 = vst.msk [vmem:[%s2946_s29 + $0xd8] sm:$0xf] %vm2035_vm8, %v2025_v3  ;;  %2579 = vpow2.f32 %v2357_v50  ;;  %v3516_v39 = vadd.f32 %v3318_v1, %v631_v37  ;;  %v1065_v52 = vsel %vm3484_vm12, %v1064_v55, %v1060_v6  ;;  %v1533_v0 = vmul.f32 %v2574_v34, %v3468_v30 }
 0x131   : > { %vm1537_vm2 = vweird.f32 %v3468_v30  ;;  %v1543_v2 = vand.u32 2147483648, %v3468_v30  ;;  %v1914_v5 = vmul.f32 %v1065_v52, %v3353_v60  ;;  %v1296_v16 = vadd.f32 %v2572_v42, %v1295_v57 }
 0x132   : > { %vm3524_vm3 = vcmp.eq.f32.partialorder %v1541_v24, 8.507059e+37  ;;  %v2373_v35 = vmul.f32 -1.442695, %v3516_v39  ;;  %v1534_v7 = vsub.f32 1.0, %v1533_v0  ;;  %vm1538_vm5 = vweird.f32 %v2574_v34 }
 0x133   : > { %v2576_v25 = vpop.eup %2575  ;;  %v3533_v26 = vadd.f32 %v3318_v1, %v671_v17  ;;  %v3536_v60 = vadd.f32 %v3318_v1, %v553_v18  ;;  %v1978_v61 = vpack.c.bf16 %v1914_v5, %v1914_v5  ;;  %v1300_v11 = vsel %vm1299_vm4, %v2572_v42, %v1296_v16  ;;  %vm1539_vm6 = vmor %vm1537_vm2, %vm1538_vm5 }
 0x134   : > { %v3538_v31 = vadd.f32 1.0, %v2576_v25  ;;  %2581 = vpow2.f32 %v2373_v35  ;;  %v1305_v14 = vsel %vm3510_vm1, %v1304_v4, %v1300_v11  ;;  %v1535_v32 = vmul.f32 %v2574_v34, %v1534_v7  ;;  %v633_v3 = vpop.f32.mrf.mxu2 }
 0x135   : > { %v2578_v29 = vpop.eup %2577  ;;  %v2389_v33 = vmul.f32 -1.442695, %v3533_v26  ;;  %v2342_v36 = vmul.f32 -1.442695, %v3536_v60  ;;  %2043 = vst.msk [vmem:[%s2946_s29 + $0x1c] sm:$0xf] %vm2035_vm8, %v1978_v61  ;;  %v1930_v22 = vmul.f32 %v1305_v14, %v3356_v62  ;;  %v3552_v41 = vadd.f32 %v3318_v1, %v593_v19 }
 0x136   : > { %v2580_v40 = vpop.eup %2579  ;;  %v1544_v12 = vor.u32 1.1754944e-38, %v1543_v2  ;;  %v1773_v38 = vmul.f32 %v2578_v29, %v3501_v56  ;;  %2583 = vrcp.f32 %v3538_v31  ;;  %v1536_v8 = vadd.f32 %v2574_v34, %v1535_v32 }
 0x137   : > { %v1781_v21 = vand.u32 2147483647, %v3501_v56  ;;  %v1783_v44 = vand.u32 2147483648, %v3501_v56  ;;  %v1994_v13 = vpack.c.bf16 %v1930_v22, %v1930_v22  ;;  %v3557_v47 = vadd.f32 1.0, %v2580_v40  ;;  %v556_v22 = vpop.f32.mrf.mxu0 }
 0x138   : > { %v1774_v62 = vsub.f32 1.0, %v1773_v38  ;;  %2585 = vpow2.f32 %v2389_v33  ;;  %v1540_v46 = vsel %vm1539_vm6, %v2574_v34, %v1536_v8  ;;  %v1076_v51 = vand.u32 2147483647, %v3538_v31 }
 0x139   : > { %v1078_v10 = vand.u32 2147483648, %v3538_v31  ;;  %2587 = vpow2.f32 %v2342_v36  ;;  %2059 = vst.msk [vmem:[%s2946_s29 + $0x5c] sm:$0xf] %vm2035_vm8, %v1994_v13  ;;  %v1545_v42 = vsel %vm3524_vm3, %v1544_v12, %v1540_v46  ;;  %vm1778_vm7 = vweird.f32 %v2578_v29 }
 0x13a   : > { %v2582_v23 = vpop.eup %2581  ;;  %v1775_v58 = vmul.f32 %v2578_v29, %v1774_v62  ;;  %2589 = vrcp.f32 %v3557_v47  ;;  %v1946_v30 = vmul.f32 %v1545_v42, %v3359_v63  ;;  %vm1777_vm9 = vweird.f32 %v3501_v56 }
 0x13b   : > { %vm3568_vm10 = vcmp.eq.f32.partialorder %v1781_v21, 8.507059e+37  ;;  %v3572_v9 = vadd.f32 1.0, %v2582_v23  ;;  %v1784_v55 = vor.u32 1.1754944e-38, %v1783_v44  ;;  %vm1072_vm11 = vweird.f32 %v3538_v31  ;;  %vm1779_vm12 = vmor %vm1777_vm9, %vm1778_vm7 }
 0x13c   : > { %v2584_v48 = vpop.eup %2583  ;;  %v1776_v59 = vadd.f32 %v2578_v29, %v1775_v58  ;;  %v2358_v15 = vmul.f32 -1.442695, %v3552_v41  ;;  %v2010_v37 = vpack.c.bf16 %v1946_v30, %v1946_v30  ;;  %vm3577_vm13 = vcmp.eq.f32.partialorder %v1076_v51, 8.507059e+37 }
 0x13d   : > { %v1068_v63 = vmul.f32 %v2584_v48, %v3538_v31  ;;  %v1079_v28 = vor.u32 1.1754944e-38, %v1078_v10  ;;  %vm1312_vm14 = vweird.f32 %v3557_v47  ;;  %v1316_v50 = vand.u32 2147483647, %v3557_v47 }
 0x13e   : > { %v2586_v43 = vpop.eup %2585  ;;  %v1780_v24 = vsel %vm1779_vm12, %v2578_v29, %v1776_v59  ;;  %2591 = vrcp.f32 %v3572_v9  ;;  %2075 = vst.msk [vmem:[%s2946_s29 + $0x9c] sm:$0xf] %vm2035_vm8, %v2010_v37  ;;  %v1318_v57 = vand.u32 2147483648, %v3557_v47  ;;  %v3590_v17 = vadd.f32 %v3318_v1, %v633_v3 }
 0x13f   : > { %v2588_v4 = vpop.eup %2587  ;;  %v1785_v34 = vsel %vm3568_vm10, %v1784_v55, %v1780_v24  ;;  %v1069_v6 = vsub.f32 1.0, %v1068_v63  ;;  %v3593_v0 = vadd.f32 1.0, %v2586_v43  ;;  %2593 = vpow2.f32 %v2358_v15  ;;  %v596_v24 = vpop.f32.mrf.mxu1 }
 0x140   : > { %v2590_v18 = vpop.eup %2589  ;;  %v1962_v52 = vmul.f32 %v1785_v34, %v3372_v54  ;;  %v3595_v2 = vadd.f32 1.0, %v2588_v4  ;;  %vm1073_vm15 = vweird.f32 %v2584_v48  ;;  %v3599_v20 = vadd.f32 %v3318_v1, %v673_v53  ;;  %v636_v34 = vpop.f32.mrf.mxu2 }
 0x141   : > { %v1070_v5 = vmul.f32 %v2584_v48, %v1069_v6  ;;  %v1308_v16 = vmul.f32 %v2590_v18, %v3557_v47  ;;  %v1556_v25 = vand.u32 2147483647, %v3572_v9  ;;  %v1558_v7 = vand.u32 2147483648, %v3572_v9  ;;  %vm1074_vm1 = vmor %vm1072_vm11, %vm1073_vm15  ;;  %v676_v6 = vpop.f32.mrf.mxu3 }
 0x142   : > { %v2026_v35 = vpack.c.bf16 %v1962_v52, %v1962_v52  ;;  %2595 = vrcp.f32 %v3593_v0  ;;  %vm3604_vm0 = vcmp.eq.f32.partialorder %v1316_v50, 8.507059e+37  ;;  %v1319_v19 = vor.u32 1.1754944e-38, %v1318_v57 }
 0x143   : > { %v1071_v54 = vadd.f32 %v2584_v48, %v1070_v5  ;;  %v1309_v61 = vsub.f32 1.0, %v1308_v16  ;;  %vm1313_vm2 = vweird.f32 %v2590_v18  ;;  %vm1552_vm3 = vweird.f32 %v3572_v9 }
 0x144   : > { %v2592_v29 = vpop.eup %2591  ;;  %2091 = vst.msk [vmem:[%s2946_s29 + $0xdc] sm:$0xf] %vm2035_vm8, %v2026_v35  ;;  %v1798_v14 = vand.u32 2147483648, %v3593_v0  ;;  %2597 = vrcp.f32 %v3595_v2  ;;  %v1796_v40 = vand.u32 2147483647, %v3593_v0  ;;  %vm3619_vm4 = vcmp.eq.f32.partialorder %v1556_v25, 8.507059e+37  ;;  %vm1314_vm6 = vmor %vm1312_vm14, %vm1313_vm2  ;;  %v558_v35 = vpop.f32.mrf.mxu0 }
 0x145   : > { %v1075_v32 = vsel %vm1074_vm1, %v2584_v48, %v1071_v54  ;;  %v1310_v33 = vmul.f32 %v2590_v18, %v1309_v61  ;;  %v1548_v36 = vmul.f32 %v2592_v29, %v3572_v9  ;;  %v2594_v12 = vpop.eup %2593  ;;  %v1559_v8 = vor.u32 1.1754944e-38, %v1558_v7 }
 0x146   : > { %v1080_v38 = vsel %vm3577_vm13, %v1079_v28, %v1075_v32  ;;  %v1091_v21 = vand.u32 2147483647, %v3595_v2  ;;  %vm1792_vm5 = vweird.f32 %v3593_v0  ;;  %v1093_v46 = vand.u32 2147483648, %v3595_v2 }
 0x147   : > { %v1915_v44 = vmul.f32 %v1080_v38, %v3401_v27  ;;  %v1311_v13 = vadd.f32 %v2590_v18, %v1310_v33  ;;  %v1549_v62 = vsub.f32 1.0, %v1548_v36  ;;  %vm1553_vm7 = vweird.f32 %v2592_v29 }
 0x148   : > { %v2596_v51 = vpop.eup %2595  ;;  %v1799_v10 = vor.u32 1.1754944e-38, %v1798_v14  ;;  %v3630_v23 = vadd.f32 1.0, %v2594_v12  ;;  %v2374_v42 = vmul.f32 -1.442695, %v3590_v17  ;;  %vm3634_vm9 = vcmp.eq.f32.partialorder %v1796_v40, 8.507059e+37  ;;  %vm1554_vm11 = vmor %vm1552_vm3, %vm1553_vm7 }
 0x149   : > { %v1979_v58 = vpack.c.bf16 %v1915_v44, %v1915_v44  ;;  %v1315_v27 = vsel %vm1314_vm6, %v2590_v18, %v1311_v13  ;;  %v1550_v30 = vmul.f32 %v2592_v29, %v1549_v62  ;;  %v1788_v49 = vmul.f32 %v2596_v51, %v3593_v0 }
 0x14a   : > { %vm1087_vm10 = vweird.f32 %v3595_v2  ;;  %v2598_v47 = vpop.eup %2597  ;;  %v1320_v59 = vsel %vm3604_vm0, %v1319_v19, %v1315_v27  ;;  %2599 = vrcp.f32 %v3630_v23  ;;  %v2390_v55 = vmul.f32 -1.442695, %v3599_v20 }
 0x14b   : > { %v3644_v15 = vadd.f32 %v3318_v1, %v556_v22  ;;  %2044 = vst.msk [vmem:[%s2946_s29 + $0x20] sm:$0xf] %vm2035_vm8, %v1979_v58  ;;  %v1931_v3 = vmul.f32 %v1320_v59, %v3420_v45  ;;  %v1551_v37 = vadd.f32 %v2592_v29, %v1550_v30  ;;  %v1789_v63 = vsub.f32 1.0, %v1788_v49 }
 0x14c   : > { %v1083_v56 = vmul.f32 %v2598_v47, %v3595_v2  ;;  %vm1793_vm12 = vweird.f32 %v2596_v51  ;;  %vm3653_vm13 = vcmp.eq.f32.partialorder %v1091_v21, 8.507059e+37  ;;  %v1094_v43 = vor.u32 1.1754944e-38, %v1093_v46 }
 0x14d   : > { %2601 = vpow2.f32 %v2374_v42  ;;  %v1995_v50 = vpack.c.bf16 %v1931_v3, %v1931_v3  ;;  %v1555_v53 = vsel %vm1554_vm11, %v2592_v29, %v1551_v37  ;;  %v1790_v45 = vmul.f32 %v2596_v51, %v1789_v63  ;;  %vm1794_vm15 = vmor %vm1792_vm5, %vm1793_vm12 }
 0x14e   : > { %v1084_v4 = vsub.f32 1.0, %v1083_v56  ;;  %v1560_v57 = vsel %vm3619_vm4, %v1559_v8, %v1555_v53  ;;  %vm1088_vm14 = vweird.f32 %v2598_v47  ;;  %v1331_v9 = vand.u32 2147483647, %v3630_v23 }
 0x14f   : > { %2603 = vpow2.f32 %v2390_v55  ;;  %2060 = vst.msk [vmem:[%s2946_s29 + $0x60] sm:$0xf] %vm2035_vm8, %v1995_v50  ;;  %v1947_v18 = vmul.f32 %v1560_v57, %v3516_v39  ;;  %v1791_v52 = vadd.f32 %v2596_v51, %v1790_v45  ;;  %v2343_v16 = vmul.f32 -1.442695, %v3644_v15  ;;  %vm1089_vm0 = vmor %vm1087_vm10, %vm1088_vm14 }
 0x150   : > { %v1085_v5 = vmul.f32 %v2598_v47, %v1084_v4  ;;  %v2600_v25 = vpop.eup %2599  ;;  %v1333_v7 = vand.u32 2147483648, %v3630_v23  ;;  %v3669_v54 = vadd.f32 %v3318_v1, %v596_v24  ;;  %v3672_v61 = vadd.f32 %v3318_v1, %v636_v34 }
 0x151   : > { %v3675_v39 = vadd.f32 %v3318_v1, %v676_v6  ;;  %v2011_v11 = vpack.c.bf16 %v1947_v18, %v1947_v18  ;;  %v1795_v19 = vsel %vm1794_vm15, %v2596_v51, %v1791_v52  ;;  %v1323_v14 = vmul.f32 %v2600_v25, %v3630_v23 }
 0x152   : > { %v1086_v29 = vadd.f32 %v2598_v47, %v1085_v5  ;;  %v1800_v0 = vsel %vm3634_vm9, %v1799_v10, %v1795_v19  ;;  %2605 = vpow2.f32 %v2343_v16  ;;  %v2359_v33 = vmul.f32 -1.442695, %v3669_v54 }
 0x153   : > { %v2602_v32 = vpop.eup %2601  ;;  %v3685_v36 = vadd.f32 %v3318_v1, %v558_v35  ;;  %2076 = vst.msk [vmem:[%s2946_s29 + $0xa0] sm:$0xf] %vm2035_vm8, %v2011_v11  ;;  %v1963_v40 = vmul.f32 %v1800_v0, %v3533_v26  ;;  %v1324_v12 = vsub.f32 1.0, %v1323_v14  ;;  %vm1328_vm1 = vweird.f32 %v2600_v25 }
 0x154   : > { %v1090_v22 = vsel %vm1089_vm0, %v2598_v47, %v1086_v29  ;;  %v3690_v38 = vadd.f32 1.0, %v2602_v32  ;;  %2607 = vpow2.f32 %v2359_v33  ;;  %v2375_v8 = vmul.f32 -1.442695, %v3672_v61  ;;  %v598_v47 = vpop.f32.mrf.mxu1 }
 0x155   : > { %v2604_v31 = vpop.eup %2603  ;;  %v1095_v2 = vsel %vm3653_vm13, %v1094_v43, %v1090_v22  ;;  %v2027_v21 = vpack.c.bf16 %v1963_v40, %v1963_v40  ;;  %v1325_v13 = vmul.f32 %v2600_v25, %v1324_v12  ;;  %v2391_v62 = vmul.f32 -1.442695, %v3675_v39  ;;  %v638_v43 = vpop.f32.mrf.mxu2 }
 0x156   : > { %v1916_v44 = vmul.f32 %v1095_v2, %v3536_v60  ;;  %2609 = vrcp.f32 %v3690_v38  ;;  %v3697_v26 = vadd.f32 1.0, %v2604_v31  ;;  %vm1327_vm2 = vweird.f32 %v3630_v23 }
 0x157   : > { %2092 = vst.msk [vmem:[%s2946_s29 + $0xe0] sm:$0xf] %vm2035_vm8, %v2027_v21  ;;  %v1326_v51 = vadd.f32 %v2600_v25, %v1325_v13  ;;  %2611 = vpow2.f32 %v2375_v8  ;;  %vm1329_vm3 = vmor %vm1327_vm2, %vm1328_vm1  ;;  %v1334_v42 = vor.u32 1.1754944e-38, %v1333_v7  ;;  %v1571_v60 = vand.u32 2147483647, %v3690_v38 }
 0x158   : > { %v1980_v46 = vpack.c.bf16 %v1916_v44, %v1916_v44  ;;  %v2606_v10 = vpop.eup %2605  ;;  %v1573_v58 = vand.u32 2147483648, %v3690_v38  ;;  %2613 = vrcp.f32 %v3697_v26  ;;  %vm1332_vm4 = vcmp.eq.f32.partialorder %v1331_v9, 8.507059e+37 }
 0x159   : > { %v1330_v27 = vsel %vm1329_vm3, %v2600_v25, %v1326_v51  ;;  %v3709_v30 = vadd.f32 1.0, %v2606_v10  ;;  %v2344_v49 = vmul.f32 -1.442695, %v3685_v36  ;;  %2615 = vpow2.f32 %v2391_v62 }
 0x15a   : > { %2045 = vst.msk [vmem:[%s2946_s29 + $0x24] sm:$0xf] %vm2035_vm8, %v1980_v46  ;;  %v2608_v23 = vpop.eup %2607  ;;  %v1335_v48 = vsel %vm1332_vm4, %v1334_v42, %v1330_v27  ;;  %vm1567_vm5 = vweird.f32 %v3690_v38  ;;  %v1811_v3 = vand.u32 2147483647, %v3697_v26  ;;  %vm3717_vm6 = vcmp.eq.f32.partialorder %v1571_v60, 8.507059e+37 }
 0x15b   : > { %v1932_v55 = vmul.f32 %v1335_v48, %v3552_v41  ;;  %2617 = vrcp.f32 %v3709_v30  ;;  %v1574_v56 = vor.u32 1.1754944e-38, %v1573_v58  ;;  %v1813_v28 = vand.u32 2147483648, %v3697_v26 }
 0x15c   : > { %v2610_v59 = vpop.eup %2609  ;;  %vm1807_vm7 = vweird.f32 %v3697_v26  ;;  %v3723_v41 = vadd.f32 1.0, %v2608_v23  ;;  %2619 = vpow2.f32 %v2344_v49  ;;  %v3726_v53 = vadd.f32 %v3318_v1, %v598_v47 }
 0x15d   : > { %v1563_v37 = vmul.f32 %v2610_v59, %v3690_v38  ;;  %v2612_v24 = vpop.eup %2611  ;;  %v1996_v50 = vpack.c.bf16 %v1932_v55, %v1932_v55  ;;  %v1106_v34 = vand.u32 2147483647, %v3709_v30  ;;  %v1108_v6 = vand.u32 2147483648, %v3709_v30  ;;  %v678_v55 = vpop.f32.mrf.mxu3 }
 0x15e   : > { %v2614_v45 = vpop.eup %2613  ;;  %v3730_v57 = vadd.f32 1.0, %v2612_v24  ;;  %vm3735_vm9 = vcmp.eq.f32.partialorder %v1811_v3, 8.507059e+37  ;;  %2621 = vrcp.f32 %v3723_v41  ;;  %v3741_v52 = vadd.f32 %v3318_v1, %v638_v43 }
 0x15f   : > { %v1564_v4 = vsub.f32 1.0, %v1563_v37  ;;  %2061 = vst.msk [vmem:[%s2946_s29 + $0x64] sm:$0xf] %vm2035_vm8, %v1996_v50  ;;  %v1803_v9 = vmul.f32 %v2614_v45, %v3697_v26  ;;  %v2616_v5 = vpop.eup %2615  ;;  %vm1568_vm10 = vweird.f32 %v2610_v59  ;;  %v1814_v35 = vor.u32 1.1754944e-38, %v1813_v28 }
 0x160   : > { %vm1102_vm11 = vweird.f32 %v3709_v30  ;;  %vm1808_vm12 = vweird.f32 %v2614_v45  ;;  %2623 = vrcp.f32 %v3730_v57  ;;  %v2360_v11 = vmul.f32 -1.442695, %v3726_v53  ;;  %vm1569_vm15 = vmor %vm1567_vm5, %vm1568_vm10 }
 0x161   : > { %v1565_v16 = vmul.f32 %v2610_v59, %v1564_v4  ;;  %v2618_v25 = vpop.eup %2617  ;;  %v1804_v7 = vsub.f32 1.0, %v1803_v9  ;;  %vm3747_vm13 = vcmp.eq.f32.partialorder %v1106_v34, 8.507059e+37  ;;  %v1109_v1 = vor.u32 1.1754944e-38, %v1108_v6  ;;  %vm1809_vm1 = vmor %vm1807_vm7, %vm1808_vm12 }
 0x162   : > { %v1098_v29 = vmul.f32 %v2618_v25, %v3709_v30  ;;  %vm1342_vm14 = vweird.f32 %v3723_v41  ;;  %v2620_v32 = vpop.eup %2619  ;;  %v1346_v33 = vand.u32 2147483647, %v3723_v41  ;;  %v1348_v40 = vand.u32 2147483648, %v3723_v41 }
 0x163   : > { %v1566_v19 = vadd.f32 %v2610_v59, %v1565_v16  ;;  %v1805_v0 = vmul.f32 %v2614_v45, %v1804_v7  ;;  %v1586_v22 = vand.u32 2147483647, %v3730_v57  ;;  %vm1103_vm0 = vweird.f32 %v2618_v25 }
 0x164   : > { %v1099_v31 = vsub.f32 1.0, %v1098_v29  ;;  %v3757_v2 = vadd.f32 1.0, %v2616_v5  ;;  %v2622_v8 = vpop.eup %2621  ;;  %v1588_v38 = vand.u32 2147483648, %v3730_v57  ;;  %2625 = vpow2.f32 %v2360_v11  ;;  %vm1104_vm4 = vmor %vm1102_vm11, %vm1103_vm0 }
 0x165   : > { %v1570_v12 = vsel %vm1569_vm15, %v2610_v59, %v1566_v19  ;;  %v1806_v44 = vadd.f32 %v2614_v45, %v1805_v0  ;;  %v1338_v46 = vmul.f32 %v2622_v8, %v3723_v41  ;;  %v3767_v51 = vadd.f32 1.0, %v2620_v32 }
 0x166   : > { %v1575_v21 = vsel %vm3717_vm6, %v1574_v56, %v1570_v12  ;;  %v1100_v62 = vmul.f32 %v2618_v25, %v1099_v31  ;;  %v2624_v10 = vpop.eup %2623  ;;  %vm3769_vm2 = vcmp.eq.f32.partialorder %v1346_v33, 8.507059e+37  ;;  %v1349_v58 = vor.u32 1.1754944e-38, %v1348_v40  ;;  %v641_v12 = vpop.f32.mrf.mxu2 }
 0x167   : > { %v1948_v13 = vmul.f32 %v1575_v21, %v3590_v17  ;;  %v1810_v42 = vsel %vm1809_vm1, %v2614_v45, %v1806_v44  ;;  %vm1582_vm3 = vweird.f32 %v3730_v57  ;;  %2627 = vrcp.f32 %v3757_v2  ;;  %v681_v44 = vpop.f32.mrf.mxu3 }
 0x168   : > { %v1815_v26 = vsel %vm3735_vm9, %v1814_v35, %v1810_v42  ;;  %v1101_v27 = vadd.f32 %v2618_v25, %v1100_v62  ;;  %v1339_v49 = vsub.f32 1.0, %v1338_v46  ;;  %vm1343_vm5 = vweird.f32 %v2622_v8  ;;  %v561_v35 = vpop.f32.mrf.mxu0  ;;  %v3835_v62 = vld [vmem:[%s4193_s2] ss:$0 sm:$0xff] }
 0x169   : > { %v2012_v17 = vpack.c.bf16 %v1948_v13, %v1948_v13  ;;  %v1964_v23 = vmul.f32 %v1815_v26, %v3599_v20  ;;  %v1578_v48 = vmul.f32 %v2624_v10, %v3730_v57  ;;  %vm3782_vm6 = vcmp.eq.f32.partialorder %v1586_v22, 8.507059e+37  ;;  %vm1344_vm10 = vmor %vm1342_vm14, %vm1343_vm5  ;;  %v601_v57 = vpop.f32.mrf.mxu1 }
 0x16a   : > { %v1589_v59 = vor.u32 1.1754944e-38, %v1588_v38  ;;  %v1105_v3 = vsel %vm1104_vm4, %v2618_v25, %v1101_v27  ;;  %v1340_v37 = vmul.f32 %v2622_v8, %v1339_v49  ;;  %v1826_v20 = vand.u32 2147483647, %v3757_v2  ;;  %v2626_v30 = vpop.eup %2625 }
 0x16b   : > { %2077 = vst.msk [vmem:[%s2946_s29 + $0xa4] sm:$0xf] %vm2035_vm8, %v2012_v17  ;;  %2629 = vrcp.f32 %v3767_v51  ;;  %v2028_v63 = vpack.c.bf16 %v1964_v23, %v1964_v23  ;;  %v1110_v56 = vsel %vm3747_vm13, %v1109_v1, %v1105_v3  ;;  %v1579_v28 = vsub.f32 1.0, %v1578_v48 }
 0x16c   : > { %v1828_v43 = vand.u32 2147483648, %v3757_v2  ;;  %v1917_v24 = vmul.f32 %v1110_v56, %v3644_v15  ;;  %v1341_v50 = vadd.f32 %v2622_v8, %v1340_v37  ;;  %vm1583_vm7 = vweird.f32 %v2624_v10 }
 0x16d   : > { %vm1822_vm9 = vweird.f32 %v3757_v2  ;;  %v2628_v45 = vpop.eup %2627  ;;  %2093 = vst.msk [vmem:[%s2946_s29 + $0xe4] sm:$0xf] %vm2035_vm8, %v2028_v63  ;;  %v1580_v4 = vmul.f32 %v2624_v10, %v1579_v28  ;;  %v1121_v34 = vand.u32 2147483647, %v3767_v51  ;;  %v1123_v6 = vand.u32 2147483648, %v3767_v51  ;;  %vm1584_vm13 = vmor %vm1582_vm3, %vm1583_vm7 }
 0x16e   : > { %v3802_v9 = vadd.f32 1.0, %v2626_v30  ;;  %v1981_v15 = vpack.c.bf16 %v1917_v24, %v1917_v24  ;;  %v1345_v18 = vsel %vm1344_vm10, %v2622_v8, %v1341_v50  ;;  %v1818_v5 = vmul.f32 %v2628_v45, %v3757_v2 }
 0x16f   : > { %vm3805_vm11 = vcmp.eq.f32.partialorder %v1826_v20, 8.507059e+37  ;;  %v1350_v41 = vsel %vm3769_vm2, %v1349_v58, %v1345_v18  ;;  %v1581_v25 = vadd.f32 %v2624_v10, %v1580_v4  ;;  %v1829_v7 = vor.u32 1.1754944e-38, %v1828_v43  ;;  %v643_v18 = vpop.f32.mrf.mxu2  ;;  %v683_v0 = vpop.f32.mrf.mxu3 }
 0x170   : > { %vm1117_vm12 = vweird.f32 %v3767_v51  ;;  %v2376_v11 = vmul.f32 -1.442695, %v3741_v52  ;;  %2046 = vst.msk [vmem:[%s2946_s29 + $0x28] sm:$0xf] %vm2035_vm8, %v1981_v15  ;;  %v1933_v29 = vmul.f32 %v1350_v41, %v3669_v54  ;;  %v1819_v14 = vsub.f32 1.0, %v1818_v5  ;;  %v563_v37 = vpop.f32.mrf.mxu0 }
 0x171   : > { %v2630_v19 = vpop.eup %2629  ;;  %vm1823_vm14 = vweird.f32 %v2628_v45  ;;  %2631 = vrcp.f32 %v3802_v9  ;;  %v1585_v1 = vsel %vm1584_vm13, %v2624_v10, %v1581_v25  ;;  %vm3821_vm15 = vcmp.eq.f32.partialorder %v1121_v34, 8.507059e+37  ;;  %v603_v34 = vpop.f32.mrf.mxu1 }
 0x172   : > { %v1113_v32 = vmul.f32 %v2630_v19, %v3767_v51  ;;  %v1124_v33 = vor.u32 1.1754944e-38, %v1123_v6  ;;  %v1997_v40 = vpack.c.bf16 %v1933_v29, %v1933_v29  ;;  %v1590_v54 = vsel %vm3782_vm6, %v1589_v59, %v1585_v1  ;;  %vm1824_vm1 = vmor %vm1822_vm9, %vm1823_vm14 }
 0x173   : > { %v1820_v22 = vmul.f32 %v2628_v45, %v1819_v14  ;;  %vm1118_vm0 = vweird.f32 %v2630_v19  ;;  %v1949_v31 = vmul.f32 %v1590_v54, %v3672_v61  ;;  %v1361_v21 = vand.u32 2147483647, %v3802_v9 }
 0x174   : > { %v1114_v8 = vsub.f32 1.0, %v1113_v32  ;;  %2633 = vpow2.f32 %v2376_v11  ;;  %2062 = vst.msk [vmem:[%s2946_s29 + $0x68] sm:$0xf] %vm2035_vm8, %v1997_v40  ;;  %v1363_v13 = vand.u32 2147483648, %v3802_v9  ;;  %v3838_v46 = vadd.f32 %v3835_v62, %v678_v55  ;;  %vm1119_vm3 = vmor %vm1117_vm12, %vm1118_vm0 }
 0x175   : > { %v1821_v38 = vadd.f32 %v2628_v45, %v1820_v22  ;;  %v3841_v61 = vadd.f32 %v3835_v62, %v561_v35  ;;  %v2013_v10 = vpack.c.bf16 %v1949_v31, %v1949_v31  ;;  %v3847_v60 = vadd.f32 %v3835_v62, %v601_v57 }
 0x176   : > { %v1115_v42 = vmul.f32 %v2630_v19, %v1114_v8  ;;  %v3850_v58 = vadd.f32 %v3835_v62, %v641_v12  ;;  %v2392_v27 = vmul.f32 -1.442695, %v3838_v46  ;;  %v3855_v23 = vadd.f32 %v3835_v62, %v681_v44 }
 0x177   : > { %v2632_v17 = vpop.eup %2631  ;;  %v1825_v26 = vsel %vm1824_vm1, %v2628_v45, %v1821_v38  ;;  %v2345_v49 = vmul.f32 -1.442695, %v3841_v61  ;;  %2078 = vst.msk [vmem:[%s2946_s29 + $0xa8] sm:$0xf] %vm2035_vm8, %v2013_v10  ;;  %v2361_v55 = vmul.f32 -1.442695, %v3847_v60  ;;  %v3875_v50 = vadd.f32 %v3835_v62, %v563_v37 }
 0x178   : > { %v1830_v2 = vsel %vm3805_vm11, %v1829_v7, %v1825_v26  ;;  %v1116_v48 = vadd.f32 %v2630_v19, %v1115_v42  ;;  %v1353_v47 = vmul.f32 %v2632_v17, %v3802_v9  ;;  %vm1358_vm2 = vweird.f32 %v2632_v17 }
 0x179   : > { %v1965_v59 = vmul.f32 %v1830_v2, %v3675_v39  ;;  %2635 = vpow2.f32 %v2392_v27  ;;  %v2377_v3 = vmul.f32 -1.442695, %v3850_v58  ;;  %v2393_v56 = vmul.f32 -1.442695, %v3855_v23 }
 0x17a   : > { %v2634_v20 = vpop.eup %2633  ;;  %v1120_v30 = vsel %vm1119_vm3, %v2630_v19, %v1116_v48  ;;  %v1354_v63 = vsub.f32 1.0, %v1353_v47  ;;  %2637 = vpow2.f32 %v2345_v49  ;;  %vm1357_vm4 = vweird.f32 %v3802_v9  ;;  %v566_v48 = vpop.f32.mrf.mxu0 }
 0x17b   : > { %v2029_v28 = vpack.c.bf16 %v1965_v59, %v1965_v59  ;;  %v1125_v39 = vsel %vm3821_vm15, %v1124_v33, %v1120_v30  ;;  %v3871_v43 = vadd.f32 1.0, %v2634_v20  ;;  %2639 = vpow2.f32 %v2361_v55  ;;  %vm1359_vm5 = vmor %vm1357_vm4, %vm1358_vm2 }
 0x17c   : > { %v1918_v51 = vmul.f32 %v1125_v39, %v3685_v36  ;;  %v1355_v24 = vmul.f32 %v2632_v17, %v1354_v63  ;;  %2641 = vpow2.f32 %v2377_v3  ;;  %vm1362_vm6 = vcmp.eq.f32.partialorder %v1361_v21, 8.507059e+37  ;;  %v646_v63 = vpop.f32.mrf.mxu2 }
 0x17d   : > { %2094 = vst.msk [vmem:[%s2946_s29 + $0xe8] sm:$0xf] %vm2035_vm8, %v2029_v28  ;;  %2643 = vrcp.f32 %v3871_v43  ;;  %v1364_v36 = vor.u32 1.1754944e-38, %v1363_v13  ;;  %v1601_v15 = vand.u32 2147483647, %v3871_v43  ;;  %v1603_v35 = vand.u32 2147483648, %v3871_v43 }
 0x17e   : > { %v1982_v45 = vpack.c.bf16 %v1918_v51, %v1918_v51  ;;  %v1356_v4 = vadd.f32 %v2632_v17, %v1355_v24  ;;  %2645 = vpow2.f32 %v2393_v56  ;;  %v2346_v9 = vmul.f32 -1.442695, %v3875_v50 }
 0x17f   : > { %v2636_v6 = vpop.eup %2635  ;;  %v3892_v19 = vadd.f32 %v3835_v62, %v603_v34  ;;  %v3897_v1 = vadd.f32 %v3835_v62, %v643_v18  ;;  %vm1597_vm7 = vweird.f32 %v3871_v43  ;;  %vm3902_vm9 = vcmp.eq.f32.partialorder %v1601_v15, 8.507059e+37 }
 0x180   : > { %v2638_v5 = vpop.eup %2637  ;;  %2047 = vst.msk [vmem:[%s2946_s29 + $0x2c] sm:$0xf] %vm2035_vm8, %v1982_v45  ;;  %v1360_v16 = vsel %vm1359_vm5, %v2632_v17, %v1356_v4  ;;  %v3886_v41 = vadd.f32 1.0, %v2636_v6  ;;  %v3919_v13 = vadd.f32 %v3835_v62, %v683_v0 }
 0x181   : > { %v2640_v25 = vpop.eup %2639  ;;  %v1365_v7 = vsel %vm1362_vm6, %v1364_v36, %v1360_v16  ;;  %v3889_v11 = vadd.f32 1.0, %v2638_v5  ;;  %v2362_v8 = vmul.f32 -1.442695, %v3892_v19  ;;  %v3916_v38 = vmul.f32 -1.442695, %v3897_v1 }
 0x182   : > { %v2642_v29 = vpop.eup %2641  ;;  %v1934_v14 = vmul.f32 %v1365_v7, %v3726_v53  ;;  %2647 = vrcp.f32 %v3886_v41  ;;  %v1604_v53 = vor.u32 1.1754944e-38, %v1603_v35  ;;  %v1841_v57 = vand.u32 2147483647, %v3886_v41 }
 0x183   : > { %v2644_v32 = vpop.eup %2643  ;;  %2649 = vrcp.f32 %v3889_v11  ;;  %v1843_v12 = vand.u32 2147483648, %v3886_v41  ;;  %v3908_v31 = vadd.f32 1.0, %v2640_v25  ;;  %v3913_v44 = vadd.f32 1.0, %v2642_v29 }
 0x184   : > { %v2646_v33 = vpop.eup %2645  ;;  %v1998_v40 = vpack.c.bf16 %v1934_v14, %v1934_v14  ;;  %v1593_v54 = vmul.f32 %v2644_v32, %v3871_v43  ;;  %2651 = vpow2.f32 %v2346_v9  ;;  %vm1837_vm10 = vweird.f32 %v3886_v41 }
 0x185   : > { %v1136_v10 = vand.u32 2147483647, %v3889_v11  ;;  %v1138_v42 = vand.u32 2147483648, %v3889_v11  ;;  %2653 = vrcp.f32 %v3908_v31  ;;  %v3925_v17 = vadd.f32 1.0, %v2646_v33 }
 0x186   : > { %2063 = vst.msk [vmem:[%s2946_s29 + $0x6c] sm:$0xf] %vm2035_vm8, %v1998_v40  ;;  %v1594_v21 = vsub.f32 1.0, %v1593_v54  ;;  %vm1598_vm11 = vweird.f32 %v2644_v32  ;;  %vm1132_vm12 = vweird.f32 %v3889_v11  ;;  %2655 = vrcp.f32 %v3913_v44 }
 0x187   : > { %vm3930_vm13 = vcmp.eq.f32.partialorder %v1841_v57, 8.507059e+37  ;;  %v1844_v47 = vor.u32 1.1754944e-38, %v1843_v12  ;;  %2657 = vpow2.f32 %v2362_v8  ;;  %v1376_v37 = vand.u32 2147483647, %v3908_v31  ;;  %vm1599_vm14 = vmor %vm1597_vm7, %vm1598_vm11 }
 0x188   : > { %v2648_v26 = vpop.eup %2647  ;;  %v1595_v27 = vmul.f32 %v2644_v32, %v1594_v21  ;;  %v1378_v20 = vand.u32 2147483648, %v3908_v31  ;;  %vm3939_vm15 = vcmp.eq.f32.partialorder %v1136_v10, 8.507059e+37  ;;  %v1139_v56 = vor.u32 1.1754944e-38, %v1138_v42 }
 0x189   : > { %v2650_v49 = vpop.eup %2649  ;;  %v1833_v2 = vmul.f32 %v2648_v26, %v3886_v41  ;;  %2659 = vrcp.f32 %v3925_v17  ;;  %vm1838_vm0 = vweird.f32 %v2648_v26  ;;  %vm1372_vm1 = vweird.f32 %v3908_v31 }
 0x18a   : > { %v2652_v59 = vpop.eup %2651  ;;  %v1596_v55 = vadd.f32 %v2644_v32, %v1595_v27  ;;  %v1128_v3 = vmul.f32 %v2650_v49, %v3889_v11  ;;  %vm1133_vm2 = vweird.f32 %v2650_v49  ;;  %vm1612_vm3 = vweird.f32 %v3913_v44  ;;  %vm1839_vm5 = vmor %vm1837_vm10, %vm1838_vm0 }
 0x18b   : > { %v1834_v30 = vsub.f32 1.0, %v1833_v2  ;;  %v2654_v51 = vpop.eup %2653  ;;  %v1616_v43 = vand.u32 2147483647, %v3913_v44  ;;  %vm3951_vm4 = vcmp.eq.f32.partialorder %v1376_v37, 8.507059e+37  ;;  %v1379_v18 = vor.u32 1.1754944e-38, %v1378_v20  ;;  %vm1134_vm7 = vmor %vm1132_vm12, %vm1133_vm2 }
 0x18c   : > { %v1600_v28 = vsel %vm1599_vm14, %v2644_v32, %v1596_v55  ;;  %v1129_v39 = vsub.f32 1.0, %v1128_v3  ;;  %v2656_v4 = vpop.eup %2655  ;;  %v1368_v36 = vmul.f32 %v2654_v51, %v3908_v31  ;;  %v1618_v9 = vand.u32 2147483648, %v3913_v44 }
 0x18d   : > { %v1605_v24 = vsel %vm3902_vm9, %v1604_v53, %v1600_v28  ;;  %v1835_v45 = vmul.f32 %v2648_v26, %v1834_v30  ;;  %v2658_v5 = vpop.eup %2657  ;;  %v1608_v35 = vmul.f32 %v2656_v4, %v3913_v44  ;;  %v1856_v25 = vand.u32 2147483647, %v3925_v17  ;;  %v606_v30 = vpop.f32.mrf.mxu1 }
 0x18e   : > { %v1950_v34 = vmul.f32 %v1605_v24, %v3741_v52  ;;  %v1130_v6 = vmul.f32 %v2650_v49, %v1129_v39  ;;  %v1369_v29 = vsub.f32 1.0, %v1368_v36  ;;  %vm1373_vm6 = vweird.f32 %v2654_v51 }
 0x18f   : > { %v1836_v16 = vadd.f32 %v2648_v26, %v1835_v45  ;;  %v2660_v14 = vpop.eup %2659  ;;  %v1609_v0 = vsub.f32 1.0, %v1608_v35  ;;  %vm1613_vm9 = vweird.f32 %v2656_v4  ;;  %v3964_v33 = vadd.f32 1.0, %v2652_v59  ;;  %vm1374_vm10 = vmor %vm1372_vm1, %vm1373_vm6 }
 0x190   : > { %v2014_v7 = vpack.c.bf16 %v1950_v34, %v1950_v34  ;;  %v1131_v52 = vadd.f32 %v2650_v49, %v1130_v6  ;;  %v1370_v54 = vmul.f32 %v2654_v51, %v1369_v29  ;;  %v1848_v22 = vmul.f32 %v2660_v14, %v3925_v17  ;;  %vm1614_vm11 = vmor %vm1612_vm3, %vm1613_vm9  ;;  %v686_v6 = vpop.f32.mrf.mxu3 }
 0x191   : > { %v1840_v32 = vsel %vm1839_vm5, %v2648_v26, %v1836_v16  ;;  %v1610_v11 = vmul.f32 %v2656_v4, %v1609_v0  ;;  %v3974_v12 = vadd.f32 1.0, %v2658_v5  ;;  %2661 = vrcp.f32 %v3964_v33 }
 0x192   : > { %2079 = vst.msk [vmem:[%s2946_s29 + $0xac] sm:$0xf] %vm2035_vm8, %v2014_v7  ;;  %v1845_v40 = vsel %vm3930_vm13, %v1844_v47, %v1840_v32  ;;  %v1135_v41 = vsel %vm1134_vm7, %v2650_v49, %v1131_v52  ;;  %v1371_v21 = vadd.f32 %v2654_v51, %v1370_v54  ;;  %v1849_v10 = vsub.f32 1.0, %v1848_v22 }
 0x193   : > { %v1966_v53 = vmul.f32 %v1845_v40, %v3838_v46  ;;  %v1140_v57 = vsel %vm3939_vm15, %v1139_v56, %v1135_v41  ;;  %v1611_v46 = vadd.f32 %v2656_v4, %v1610_v11  ;;  %v1619_v26 = vor.u32 1.1754944e-38, %v1618_v9 }
 0x194   : > { %v1919_v8 = vmul.f32 %v1140_v57, %v3841_v61  ;;  %v1858_v27 = vand.u32 2147483648, %v3925_v17  ;;  %v1375_v2 = vsel %vm1374_vm10, %v2654_v51, %v1371_v21  ;;  %v1850_v61 = vmul.f32 %v2660_v14, %v1849_v10 }
 0x195   : > { %v2030_v42 = vpack.c.bf16 %v1966_v53, %v1966_v53  ;;  %vm1853_vm12 = vweird.f32 %v2660_v14  ;;  %v1380_v31 = vsel %vm3951_vm4, %v1379_v18, %v1375_v2  ;;  %v1615_v47 = vsel %vm1614_vm11, %v2656_v4, %v1611_v46  ;;  %v608_v11 = vpop.f32.mrf.mxu1 }
 0x196   : > { %v1983_v49 = vpack.c.bf16 %v1919_v8, %v1919_v8  ;;  %vm1617_vm13 = vcmp.eq.f32.partialorder %v1616_v43, 8.507059e+37  ;;  %2663 = vrcp.f32 %v3974_v12  ;;  %v1935_v59 = vmul.f32 %v1380_v31, %v3847_v60  ;;  %v648_v8 = vpop.f32.mrf.mxu2 }
 0x197   : > { %2095 = vst.msk [vmem:[%s2946_s29 + $0xec] sm:$0xf] %vm2035_vm8, %v2030_v42  ;;  %v1620_v55 = vsel %vm1617_vm13, %v1619_v26, %v1615_v47  ;;  %v1851_v3 = vadd.f32 %v2660_v14, %v1850_v61  ;;  %vm1852_vm14 = vweird.f32 %v3925_v17  ;;  %vm1857_vm0 = vcmp.eq.f32.partialorder %v1856_v25, 8.507059e+37  ;;  %v2662_v56 = vpop.eup %2661 }
 0x198   : > { %2048 = vst.msk [vmem:[%s2946_s29 + $0x30] sm:$0xf] %vm2035_vm8, %v1983_v49  ;;  %v1951_v44 = vmul.f32 %v1620_v55, %v3850_v58  ;;  %vm1854_vm15 = vmor %vm1852_vm14, %vm1853_vm12  ;;  %v1859_v37 = vor.u32 1.1754944e-38, %v1858_v27  ;;  %v1151_v20 = vand.u32 2147483647, %v3964_v33  ;;  %v1999_v28 = vpack.c.bf16 %v1935_v59, %v1935_v59 }
 0x199   : > { %v1855_v39 = vsel %vm1854_vm15, %v2660_v14, %v1851_v3  ;;  %2665 = vpow2.f32 %v3916_v38  ;;  %v2394_v60 = vmul.f32 -1.442695, %v3919_v13  ;;  %v1143_v24 = vmul.f32 %v2662_v56, %v3964_v33  ;;  %v568_v14 = vpop.f32.mrf.mxu0 }
 0x19a   : > { %v2015_v51 = vpack.c.bf16 %v1951_v44, %v1951_v44  ;;  %v1860_v17 = vsel %vm1857_vm0, %v1859_v37, %v1855_v39  ;;  %2064 = vst.msk [vmem:[%s2946_s29 + $0x70] sm:$0xf] %vm2035_vm8, %v1999_v28  ;;  %vm1147_vm1 = vweird.f32 %v3964_v33  ;;  %v4006_v38 = vadd.f32 %v3835_v62, %v566_v48 }
 0x19b   : > { %v1967_v58 = vmul.f32 %v1860_v17, %v3855_v23  ;;  %2667 = vpow2.f32 %v2394_v60  ;;  %v1144_v43 = vsub.f32 1.0, %v1143_v24  ;;  %v4009_v4 = vadd.f32 %v3835_v62, %v606_v30 }
 0x19c   : > { %v2664_v45 = vpop.eup %2663  ;;  %2080 = vst.msk [vmem:[%s2946_s29 + $0xb0] sm:$0xf] %vm2035_vm8, %v2015_v51  ;;  %v4012_v34 = vadd.f32 %v3835_v62, %v646_v63  ;;  %vm4014_vm2 = vcmp.eq.f32.partialorder %v1151_v20, 8.507059e+37  ;;  %v1153_v15 = vand.u32 2147483648, %v3964_v33  ;;  %vm1148_vm3 = vweird.f32 %v2662_v56 }
 0x19d   : > { %v2031_v36 = vpack.c.bf16 %v1967_v58, %v1967_v58  ;;  %v1383_v18 = vmul.f32 %v2664_v45, %v3974_v12  ;;  %v1145_v5 = vmul.f32 %v2662_v56, %v1144_v43  ;;  %v2347_v16 = vmul.f32 -1.442695, %v4006_v38  ;;  %vm1149_vm4 = vmor %vm1147_vm1, %vm1148_vm3 }
 0x19e   : > { %v2363_v35 = vmul.f32 -1.442695, %v4009_v4  ;;  %v1391_v7 = vand.u32 2147483647, %v3974_v12  ;;  %v1393_v52 = vand.u32 2147483648, %v3974_v12  ;;  %v4027_v29 = vadd.f32 %v3835_v62, %v686_v6 }
 0x19f   : > { %v2666_v9 = vpop.eup %2665  ;;  %2096 = vst.msk [vmem:[%s2946_s29 + $0xf0] sm:$0xf] %vm2035_vm8, %v2031_v36  ;;  %v1384_v25 = vsub.f32 1.0, %v1383_v18  ;;  %v1146_v32 = vadd.f32 %v2662_v56, %v1145_v5  ;;  %2669 = vpow2.f32 %v2347_v16  ;;  %v2379_v40 = vmul.f32 -1.442695, %v4012_v34 }
 0x1a0   : > { %v4029_v0 = vadd.f32 1.0, %v2666_v9  ;;  %v1154_v54 = vor.u32 1.1754944e-38, %v1153_v15  ;;  %vm1388_vm5 = vweird.f32 %v2664_v45  ;;  %2671 = vpow2.f32 %v2363_v35 }
 0x1a1   : > { %v2668_v41 = vpop.eup %2667  ;;  %v1385_v22 = vmul.f32 %v2664_v45, %v1384_v25  ;;  %v1150_v53 = vsel %vm1149_vm4, %v2662_v56, %v1146_v32  ;;  %vm1387_vm6 = vweird.f32 %v3974_v12  ;;  %v4038_v57 = vadd.f32 %v3835_v62, %v568_v14  ;;  %v688_v56 = vpop.f32.mrf.mxu3 }
 0x1a2   : > { %2673 = vrcp.f32 %v4029_v0  ;;  %v1155_v21 = vsel %vm4014_vm2, %v1154_v54, %v1150_v53  ;;  %v4042_v33 = vadd.f32 1.0, %v2668_v41  ;;  %v2395_v42 = vmul.f32 -1.442695, %v4027_v29  ;;  %vm1389_vm7 = vmor %vm1387_vm6, %vm1388_vm5 }
 0x1a3   : > { %v1386_v10 = vadd.f32 %v2664_v45, %v1385_v22  ;;  %v1920_v46 = vmul.f32 %v1155_v21, %v3875_v50  ;;  %vm1392_vm9 = vcmp.eq.f32.partialorder %v1391_v7, 8.507059e+37  ;;  %v1394_v12 = vor.u32 1.1754944e-38, %v1393_v52 }
 0x1a4   : > { %2675 = vpow2.f32 %v2379_v40  ;;  %v4048_v27 = vadd.f32 %v3835_v62, %v608_v11  ;;  %v4051_v49 = vadd.f32 %v3835_v62, %v648_v8  ;;  %v1631_v31 = vand.u32 2147483647, %v4029_v0 }
 0x1a5   : > { %v1390_v26 = vsel %vm1389_vm7, %v2664_v45, %v1386_v10  ;;  %2677 = vrcp.f32 %v4042_v33  ;;  %v2670_v2 = vpop.eup %2669  ;;  %v1984_v61 = vpack.c.bf16 %v1920_v46, %v1920_v46  ;;  %v2348_v50 = vmul.f32 -1.442695, %v4038_v57 }
 0x1a6   : > { %v1395_v48 = vsel %vm1392_vm9, %v1394_v12, %v1390_v26  ;;  %v2672_v47 = vpop.eup %2671  ;;  %v1633_v55 = vand.u32 2147483648, %v4029_v0  ;;  %v4057_v3 = vadd.f32 1.0, %v2670_v2  ;;  %2679 = vpow2.f32 %v2395_v42 }
 0x1a7   : > { %v1936_v59 = vmul.f32 %v1395_v48, %v3892_v19  ;;  %2049 = vst.msk [vmem:[%s2946_s29 + $0x34] sm:$0xf] %vm2035_vm8, %v1984_v61  ;;  %v1871_v37 = vand.u32 2147483647, %v4042_v33  ;;  %v4062_v20 = vadd.f32 1.0, %v2672_v47  ;;  %vm1627_vm10 = vweird.f32 %v4029_v0 }
 0x1a8   : > { %v2674_v44 = vpop.eup %2673  ;;  %2681 = vrcp.f32 %v4057_v3  ;;  %v2364_v19 = vmul.f32 -1.442695, %v4048_v27  ;;  %vm4068_vm11 = vcmp.eq.f32.partialorder %v1631_v31, 8.507059e+37  ;;  %v1873_v60 = vand.u32 2147483648, %v4042_v33 }
 0x1a9   : > { %v2000_v30 = vpack.c.bf16 %v1936_v59, %v1936_v59  ;;  %v1623_v63 = vmul.f32 %v2674_v44, %v4029_v0  ;;  %2683 = vrcp.f32 %v4062_v20  ;;  %v1634_v24 = vor.u32 1.1754944e-38, %v1633_v55 }
 0x1aa   : > { %v2676_v28 = vpop.eup %2675  ;;  %vm1867_vm12 = vweird.f32 %v4042_v33  ;;  %v4078_v58 = vmul.f32 -1.442695, %v4051_v49  ;;  %vm4081_vm13 = vcmp.eq.f32.partialorder %v1871_v37, 8.507059e+37  ;;  %2685 = vpow2.f32 %v2348_v50 }
 0x1ab   : > { %v2678_v51 = vpop.eup %2677  ;;  %2065 = vst.msk [vmem:[%s2946_s29 + $0x74] sm:$0xf] %vm2035_vm8, %v2000_v30  ;;  %v1624_v17 = vsub.f32 1.0, %v1623_v63  ;;  %v4086_v6 = vadd.f32 %v3835_v62, %v688_v56  ;;  %vm1628_vm14 = vweird.f32 %v2674_v44  ;;  %v1166_v15 = vand.u32 2147483647, %v4057_v3 }
 0x1ac   : > { %v1863_v45 = vmul.f32 %v2678_v51, %v4042_v33  ;;  %v2680_v36 = vpop.eup %2679  ;;  %v4089_v18 = vadd.f32 1.0, %v2676_v28  ;;  %v1874_v16 = vor.u32 1.1754944e-38, %v1873_v60  ;;  %vm1162_vm15 = vweird.f32 %v4057_v3  ;;  %vm1629_vm1 = vmor %vm1627_vm10, %vm1628_vm14 }
 0x1ad   : > { %v1625_v23 = vmul.f32 %v2674_v44, %v1624_v17  ;;  %v1168_v35 = vand.u32 2147483648, %v4057_v3  ;;  %vm1402_vm0 = vweird.f32 %v4062_v20  ;;  %v4095_v62 = vadd.f32 1.0, %v2680_v36 }
 0x1ae   : > { %v1864_v5 = vsub.f32 1.0, %v1863_v45  ;;  %v2682_v9 = vpop.eup %2681  ;;  %2687 = vrcp.f32 %v4089_v18  ;;  %vm1868_vm2 = vweird.f32 %v2678_v51  ;;  %v1406_v32 = vand.u32 2147483647, %v4062_v20 }
 0x1af   : > { %v1626_v25 = vadd.f32 %v2674_v44, %v1625_v23  ;;  %v2684_v7 = vpop.eup %2683  ;;  %v1158_v14 = vmul.f32 %v2682_v9, %v4057_v3  ;;  %vm4101_vm3 = vcmp.eq.f32.partialorder %v1166_v15, 8.507059e+37  ;;  %v1408_v22 = vand.u32 2147483648, %v4062_v20  ;;  %vm1869_vm4 = vmor %vm1867_vm12, %vm1868_vm2 }
 0x1b0   : > { %v1865_v52 = vmul.f32 %v2678_v51, %v1864_v5  ;;  %v1398_v54 = vmul.f32 %v2684_v7, %v4062_v20  ;;  %v2686_v53 = vpop.eup %2685  ;;  %2689 = vpow2.f32 %v2364_v19  ;;  %v1169_v10 = vor.u32 1.1754944e-38, %v1168_v35 }
 0x1b1   : > { %v1630_v40 = vsel %vm1629_vm1, %v2674_v44, %v1626_v25  ;;  %v1159_v8 = vsub.f32 1.0, %v1158_v14  ;;  %2691 = vrcp.f32 %v4095_v62  ;;  %vm1163_vm5 = vweird.f32 %v2682_v9 }
 0x1b2   : > { %v1635_v0 = vsel %vm4068_vm11, %v1634_v24, %v1630_v40  ;;  %v1866_v11 = vadd.f32 %v2678_v51, %v1865_v52  ;;  %v1399_v42 = vsub.f32 1.0, %v1398_v54  ;;  %vm1403_vm6 = vweird.f32 %v2684_v7  ;;  %vm1164_vm9 = vmor %vm1162_vm15, %vm1163_vm5 }
 0x1b3   : > { %v1952_v21 = vmul.f32 %v1635_v0, %v3897_v1  ;;  %v1160_v12 = vmul.f32 %v2682_v9, %v1159_v8  ;;  %v4115_v31 = vadd.f32 1.0, %v2686_v53  ;;  %vm4118_vm7 = vcmp.eq.f32.partialorder %v1406_v32, 8.507059e+37  ;;  %vm1404_vm10 = vmor %vm1402_vm0, %vm1403_vm6 }
 0x1b4   : > { %v1870_v46 = vsel %vm1869_vm4, %v2678_v51, %v1866_v11  ;;  %v2688_v26 = vpop.eup %2687  ;;  %v1400_v48 = vmul.f32 %v2684_v7, %v1399_v42  ;;  %v1409_v55 = vor.u32 1.1754944e-38, %v1408_v22  ;;  %v1646_v44 = vand.u32 2147483647, %v4089_v18 }
 0x1b5   : > { %v2016_v2 = vpack.c.bf16 %v1952_v21, %v1952_v21  ;;  %v1875_v61 = vsel %vm4081_vm13, %v1874_v16, %v1870_v46  ;;  %v1161_v33 = vadd.f32 %v2682_v9, %v1160_v12  ;;  %v1638_v47 = vmul.f32 %v2688_v26, %v4089_v18 }
 0x1b6   : > { %v1968_v1 = vmul.f32 %v1875_v61, %v3919_v13  ;;  %v1401_v59 = vadd.f32 %v2684_v7, %v1400_v48  ;;  %2693 = vrcp.f32 %v4115_v31  ;;  %v2690_v13 = vpop.eup %2689  ;;  %v2396_v19 = vmul.f32 -1.442695, %v4086_v6 }
 0x1b7   : > { %2081 = vst.msk [vmem:[%s2946_s29 + $0xb4] sm:$0xf] %vm2035_vm8, %v2016_v2  ;;  %v1165_v30 = vsel %vm1164_vm9, %v2682_v9, %v1161_v33  ;;  %v1639_v63 = vsub.f32 1.0, %v1638_v47  ;;  %v2692_v56 = vpop.eup %2691  ;;  %vm1643_vm11 = vweird.f32 %v2688_v26  ;;  %v1648_v39 = vand.u32 2147483648, %v4089_v18 }
 0x1b8   : > { %v2032_v37 = vpack.c.bf16 %v1968_v1, %v1968_v1  ;;  %v1170_v3 = vsel %vm4101_vm3, %v1169_v10, %v1165_v30  ;;  %v1405_v28 = vsel %vm1404_vm10, %v2684_v7, %v1401_v59  ;;  %v1878_v17 = vmul.f32 %v2692_v56, %v4095_v62 }
 0x1b9   : > { %v1921_v60 = vmul.f32 %v1170_v3, %v4006_v38  ;;  %v1410_v51 = vsel %vm4118_vm7, %v1409_v55, %v1405_v28  ;;  %v1640_v20 = vmul.f32 %v2688_v26, %v1639_v63  ;;  %vm1642_vm12 = vweird.f32 %v4089_v18 }
 0x1ba   : > { %2097 = vst.msk [vmem:[%s2946_s29 + $0xf4] sm:$0xf] %vm2035_vm8, %v2032_v37  ;;  %v1937_v24 = vmul.f32 %v1410_v51, %v4009_v4  ;;  %vm4144_vm13 = vcmp.eq.f32.partialorder %v1646_v44, 8.507059e+37  ;;  %v1886_v43 = vand.u32 2147483647, %v4095_v62  ;;  %v1879_v23 = vsub.f32 1.0, %v1878_v17  ;;  %vm1644_vm14 = vmor %vm1642_vm12, %vm1643_vm11 }
 0x1bb   : > { %v1985_v36 = vpack.c.bf16 %v1921_v60, %v1921_v60  ;;  %v1641_v38 = vadd.f32 %v2688_v26, %v1640_v20  ;;  %v4149_v15 = vadd.f32 1.0, %v2690_v13  ;;  %v1649_v35 = vor.u32 1.1754944e-38, %v1648_v39 }
 0x1bc   : > { %v2694_v5 = vpop.eup %2693  ;;  %v2001_v16 = vpack.c.bf16 %v1937_v24, %v1937_v24  ;;  %v1888_v4 = vand.u32 2147483648, %v4095_v62  ;;  %2695 = vpow2.f32 %v4078_v58  ;;  %v1880_v9 = vmul.f32 %v2692_v56, %v1879_v23 }
 0x1bd   : > { %2050 = vst.msk [vmem:[%s2946_s29 + $0x38] sm:$0xf] %vm2035_vm8, %v1985_v36  ;;  %v1645_v18 = vsel %vm1644_vm14, %v2688_v26, %v1641_v38  ;;  %vm1883_vm15 = vweird.f32 %v2692_v56  ;;  %v1173_v25 = vmul.f32 %v2694_v5, %v4115_v31  ;;  %vm1882_vm0 = vweird.f32 %v4095_v62 }
 0x1be   : > { %2066 = vst.msk [vmem:[%s2946_s29 + $0x78] sm:$0xf] %vm2035_vm8, %v2001_v16  ;;  %v1650_v7 = vsel %vm4144_vm13, %v1649_v35, %v1645_v18  ;;  %2697 = vrcp.f32 %v4149_v15  ;;  %v1881_v58 = vadd.f32 %v2692_v56, %v1880_v9  ;;  %vm1887_vm1 = vcmp.eq.f32.partialorder %v1886_v43, 8.507059e+37  ;;  %vm1884_vm2 = vmor %vm1882_vm0, %vm1883_vm15 }
 0x1bf   : > { %v1953_v52 = vmul.f32 %v1650_v7, %v4012_v34  ;;  %v1174_v14 = vsub.f32 1.0, %v1173_v25  ;;  %v1889_v32 = vor.u32 1.1754944e-38, %v1888_v4  ;;  %v1181_v40 = vand.u32 2147483647, %v4115_v31 }
 0x1c0   : > { %v1183_v41 = vand.u32 2147483648, %v4115_v31  ;;  %2699 = vpow2.f32 %v2396_v19  ;;  %v1885_v22 = vsel %vm1884_vm2, %v2692_v56, %v1881_v58  ;;  %vm1178_vm3 = vweird.f32 %v2694_v5 }
 0x1c1   : > { %v2017_v54 = vpack.c.bf16 %v1953_v52, %v1953_v52  ;;  %v1175_v53 = vmul.f32 %v2694_v5, %v1174_v14  ;;  %v1890_v0 = vsel %vm1887_vm1, %v1889_v32, %v1885_v22  ;;  %vm1177_vm4 = vweird.f32 %v4115_v31 }
 0x1c2   : > { %v2696_v62 = vpop.eup %2695  ;;  %v1969_v34 = vmul.f32 %v1890_v0, %v4027_v29  ;;  %vm1179_vm5 = vmor %vm1177_vm4, %vm1178_vm3  ;;  %v1184_v10 = vor.u32 1.1754944e-38, %v1183_v41  ;;  %vm1182_vm6 = vcmp.eq.f32.partialorder %v1181_v40, 8.507059e+37  ;;  %v1421_v31 = vand.u32 2147483647, %v4149_v15 }
 0x1c3   : > { %2082 = vst.msk [vmem:[%s2946_s29 + $0xb8] sm:$0xf] %vm2035_vm8, %v2017_v54  ;;  %v1176_v11 = vadd.f32 %v2694_v5, %v1175_v53  ;;  %v930_v8 = vadd.f32 1.0, %v2696_v62  ;;  %v1423_v1 = vand.u32 2147483648, %v4149_v15  ;;  %vm1417_vm9 = vweird.f32 %v4149_v15 }
 0x1c4   : > { %v2698_v21 = vpop.eup %2697  ;;  %v2033_v42 = vpack.c.bf16 %v1969_v34, %v1969_v34  ;;  %vm1422_vm11 = vcmp.eq.f32.partialorder %v1421_v31, 8.507059e+37 }
 0x1c5   : > { %v1180_v46 = vsel %vm1179_vm5, %v2694_v5, %v1176_v11  ;;  %v1413_v12 = vmul.f32 %v2698_v21, %v4149_v15  ;;  %2701 = vrcp.f32 %v930_v8  ;;  %vm1418_vm7 = vweird.f32 %v2698_v21 }
 0x1c6   : > { %v2700_v26 = vpop.eup %2699  ;;  %v1185_v2 = vsel %vm1182_vm6, %v1184_v10, %v1180_v46  ;;  %2098 = vst.msk [vmem:[%s2946_s29 + $0xf8] sm:$0xf] %vm2035_vm8, %v2033_v42  ;;  %vm1419_vm10 = vmor %vm1417_vm9, %vm1418_vm7  ;;  %v1424_v55 = vor.u32 1.1754944e-38, %v1423_v1  ;;  %v1663_v19 = vand.u32 2147483648, %v930_v8  ;;  %v1661_v39 = vand.u32 2147483647, %v930_v8 }
 0x1c7   : > { %v1922_v29 = vmul.f32 %v1185_v2, %v4038_v57  ;;  %v1414_v61 = vsub.f32 1.0, %v1413_v12  ;;  %v946_v48 = vadd.f32 1.0, %v2700_v26  ;;  %vm1657_vm13 = vweird.f32 %v930_v8 }
 0x1c8   : > { %v1664_v17 = vor.u32 1.1754944e-38, %v1663_v19  ;;  %vm1662_vm0 = vcmp.eq.f32.partialorder %v1661_v39, 8.507059e+37 }
 0x1c9   : > { %v1986_v33 = vpack.c.bf16 %v1922_v29, %v1922_v29  ;;  %v1415_v50 = vmul.f32 %v2698_v21, %v1414_v61  ;;  %2703 = vrcp.f32 %v946_v48  ;;  %v1903_v20 = vand.u32 2147483648, %v946_v48 }
 0x1ca   : > { %v1901_v45 = vand.u32 2147483647, %v946_v48  ;;  %vm1897_vm1 = vweird.f32 %v946_v48 }
 0x1cb   : > { %2051 = vst.msk [vmem:[%s2946_s29 + $0x3c] sm:$0xf] %vm2035_vm8, %v1986_v33  ;;  %v1416_v47 = vadd.f32 %v2698_v21, %v1415_v50  ;;  %v2702_v59 = vpop.eup %2701  ;;  %v1904_v23 = vor.u32 1.1754944e-38, %v1903_v20 }
 0x1cc   : > { %v1653_v44 = vmul.f32 %v2702_v59, %v930_v8  ;;  %vm1658_vm12 = vweird.f32 %v2702_v59  ;;  %vm1902_vm3 = vcmp.eq.f32.partialorder %v1901_v45, 8.507059e+37 }
 0x1cd   : > { %v1420_v57 = vsel %vm1419_vm10, %v2698_v21, %v1416_v47  ;;  %vm1659_vm14 = vmor %vm1657_vm13, %vm1658_vm12 }
 0x1ce   : > { %v1425_v13 = vsel %vm1422_vm11, %v1424_v55, %v1420_v57  ;;  %v1654_v63 = vsub.f32 1.0, %v1653_v44 }
 0x1cf   : > { %v2704_v37 = vpop.eup %2703  ;;  %v1938_v30 = vmul.f32 %v1425_v13, %v4048_v27 }
 0x1d0   : > { %v1893_v56 = vmul.f32 %v2704_v37, %v946_v48  ;;  %v1655_v28 = vmul.f32 %v2702_v59, %v1654_v63  ;;  %vm1898_vm15 = vweird.f32 %v2704_v37 }
 0x1d1   : > { %v2002_v3 = vpack.c.bf16 %v1938_v30, %v1938_v30  ;;  %vm1899_vm2 = vmor %vm1897_vm1, %vm1898_vm15 }
 0x1d2   : > { %v1894_v60 = vsub.f32 1.0, %v1893_v56  ;;  %v1656_v51 = vadd.f32 %v2702_v59, %v1655_v28 }
 0x1d3   : > { %2067 = vst.msk [vmem:[%s2946_s29 + $0x7c] sm:$0xf] %vm2035_vm8, %v2002_v3 }
 0x1d4   : > { %v1895_v24 = vmul.f32 %v2704_v37, %v1894_v60  ;;  %v1660_v27 = vsel %vm1659_vm14, %v2702_v59, %v1656_v51 }
 0x1d5   : > { %v1665_v43 = vsel %vm1662_vm0, %v1664_v17, %v1660_v27 }
 0x1d6   : > { %v1896_v36 = vadd.f32 %v2704_v37, %v1895_v24  ;;  %v1954_v38 = vmul.f32 %v1665_v43, %v4051_v49 }
 0x1d8   : > { %v1900_v15 = vsel %vm1899_vm2, %v2704_v37, %v1896_v36  ;;  %v2018_v5 = vpack.c.bf16 %v1954_v38, %v1954_v38 }
 0x1d9   : > { %v1905_v16 = vsel %vm1902_vm3, %v1904_v23, %v1900_v15 }
 0x1da   : > { %v1970_v35 = vmul.f32 %v1905_v16, %v4086_v6  ;;  %2083 = vst.msk [vmem:[%s2946_s29 + $0xbc] sm:$0xf] %vm2035_vm8, %v2018_v5 }
 0x1dc   : > { %v2034_v4 = vpack.c.bf16 %v1970_v35, %v1970_v35 }
 0x1de   : > { %2099 = vst.msk [vmem:[%s2946_s29 + $0xfc] sm:$0xf] %vm2035_vm8, %v2034_v4 }
 0x1df PF: > { %s13_s12 = sadd.s32 1, %s2713_s12  }
 0x1e0   : > { %p10_p4 = scmp.ge.s32.totalorder %s13_s12, 6  }
 0x1e2   :  { %12 = sbr.rel (!%p10_p4) target bundleno = 1 (0x1), region = 62 }

</bundles_post_ra>
